<compile_context>
chip_gen: v7x
topology: tpu7x:2x2x1
jax: 0.10.0
libtpu: 0.0.40
codegen_flags: <defaults>
</compile_context>

<pallas_src>
import functools
import math

import jax
import jax.numpy as jnp
import numpy as np
from jax.experimental import pallas as pl
from jax.experimental.pallas import tpu as pltpu

_LN_EPS = 1e-5
_NEG = -1e9          # finite "-inf": exp() stays well-defined for rows fully masked in a kv tile
_VMEM_LIMIT = 64 * 1024 * 1024


# ----------------------------------------------------------------------------
# Tile picker: largest aligned divisor of `dim` not exceeding `cap`
# (falls back to the full dim for small / awkward shapes).
# ----------------------------------------------------------------------------
def _pick_tile(dim, cap):
    for t in (512, 384, 256, 128, 64, 32, 16, 8):
        if t <= cap and dim % t == 0:
            return t
    return dim


# ----------------------------------------------------------------------------
# Kernel: [optional LayerNorm] -> matmul (optionally K-tiled) -> [bias] -> [GELU] -> [residual]
# ----------------------------------------------------------------------------
def _ln_mm_kernel(*refs, apply_ln, has_bias, activation, add_residual, eps, k_tiled):
    it = iter(refs)
    x_ref = next(it)
    if apply_ln:
        g_ref = next(it)
        bln_ref = next(it)
    w_ref = next(it)
    if has_bias:
        b_ref = next(it)
    if add_residual:
        r_ref = next(it)
    o_ref = next(it)
    acc_ref = next(it) if k_tiled else None

    x = x_ref[...]
    if apply_ln:
        xf = x.astype(jnp.float32)
        mu = jnp.mean(xf, axis=-1, keepdims=True)
        xc = xf - mu
        var = jnp.mean(xc * xc, axis=-1, keepdims=True)
        xn = xc * jax.lax.rsqrt(var + eps)
        x = (xn * g_ref[...].astype(jnp.float32)
             + bln_ref[...].astype(jnp.float32)).astype(x_ref.dtype)

    part = jnp.dot(x, w_ref[...], preferred_element_type=jnp.float32)

    def epilogue(y):
        if has_bias:
            y = y + b_ref[...].astype(jnp.float32)
        if activation == "gelu":
            # TODO(synk): PyTorch nn.GELU() defaults to exact erf; tanh approximation used here
            # (and in the reference) since erf has no guaranteed Mosaic lowering.
            y = jax.nn.gelu(y, approximate=True)
        if add_residual:
            y = y + r_ref[...].astype(jnp.float32)
        o_ref[...] = y.astype(o_ref.dtype)

    if k_tiled:
        kk = pl.program_id(2)

        @pl.when(kk == 0)
        def _():
            acc_ref[...] = jnp.zeros(acc_ref.shape, acc_ref.dtype)

        acc_ref[...] += part

        @pl.when(kk == pl.num_programs(2) - 1)
        def _():
            epilogue(acc_ref[...])
    else:
        epilogue(part)


def ln_matmul(x, w, b=None, *, ln_params=None, activation=None, residual=None,
              out_dtype=None, tm=None, tn=None, tk=None):
    """out = [GELU]( LN(x) @ w + b ) + residual.

    (M, N_out) tiled; K stays whole when LN is fused (LN needs the full feature row),
    otherwise K may be tiled with an f32 VMEM accumulator (v7x-friendly weight panels)."""
    M, K = x.shape
    Kw, Nout = w.shape
    assert K == Kw
    apply_ln = ln_params is not None

    tm = tm or _pick_tile(M, 256)
    tn = tn or _pick_tile(Nout, 512)
    if apply_ln:
        tk = K
    else:
        tk = tk or _pick_tile(K, 512)
    nk = K // tk
    k_tiled = nk > 1
    assert not (k_tiled and apply_ln), "LayerNorm fusion requires an un-tiled K"

    grid = (M // tm, Nout // tn, nk)

    in_specs = [pl.BlockSpec((tm, tk), lambda i, j, k: (i, k))]
    inputs = [x]
    if apply_ln:
        g, bln = ln_params  # each (1, K)
        in_specs += [pl.BlockSpec((1, K), lambda i, j, k: (0, 0)),
                     pl.BlockSpec((1, K), lambda i, j, k: (0, 0))]
        inputs += [g, bln]
    in_specs.append(pl.BlockSpec((tk, tn), lambda i, j, k: (k, j)))
    inputs.append(w)
    if b is not None:
        in_specs.append(pl.BlockSpec((1, tn), lambda i, j, k: (0, j)))
        inputs.append(b)
    if residual is not None:
        in_specs.append(pl.BlockSpec((tm, tn), lambda i, j, k: (i, j)))
        inputs.append(residual)

    kernel = functools.partial(
        _ln_mm_kernel,
        apply_ln=apply_ln,
        has_bias=b is not None,
        activation=activation,
        add_residual=residual is not None,
        eps=_LN_EPS,
        k_tiled=k_tiled,
    )
    return pl.pallas_call(
        kernel,
        out_shape=jax.ShapeDtypeStruct((M, Nout), out_dtype or x.dtype),
        grid=grid,
        in_specs=in_specs,
        out_specs=pl.BlockSpec((tm, tn), lambda i, j, k: (i, j)),
        scratch_shapes=[pltpu.VMEM((tm, tn), jnp.float32)] if k_tiled else [],
        compiler_params=pltpu.CompilerParams(
            dimension_semantics=("parallel", "parallel", "arbitrary"),
            vmem_limit_bytes=_VMEM_LIMIT),
    )(*inputs)


# ----------------------------------------------------------------------------
# Kernel: flash attention + residual + LayerNorm2 + FiLM conditioning
# (triangular flattened kv grid via scalar prefetch; lane-dense accumulators)
# ----------------------------------------------------------------------------
def _flash_attn_kernel(qi_tbl, ki_tbl,                       # scalar-prefetch SMEM refs
                       q_ref, k_ref, v_ref, xres_ref, ab_ref, g2_ref, b2_ref,
                       o_ref, m_sc, l_sc, acc_sc,
                       *, H, D, E, scale, tq, tkv, chunk, nkv, eps, neg):
    s_idx = pl.program_id(1)
    qi = qi_tbl[s_idx]
    ki = ki_tbl[s_idx]

    @pl.when(ki == 0)
    def _init():
        m_sc[...] = jnp.full(m_sc.shape, neg, m_sc.dtype)
        l_sc[...] = jnp.zeros(l_sc.shape, l_sc.dtype)
        acc_sc[...] = jnp.zeros(acc_sc.shape, acc_sc.dtype)

    q = q_ref[0]                                   # (tq, E), kept in input dtype for the MXU
    q = q * jnp.asarray(scale, q.dtype)            # softmax scale folded into q once
    k = k_ref[0]                                   # (tkv, E)
    v = v_ref[0]                                   # (tkv, E)

    def attend(masked):
        if masked:
            row = qi * tq + jax.lax.broadcasted_iota(jnp.int32, (tq, tkv), 0)
            col = ki * tkv + jax.lax.broadcasted_iota(jnp.int32, (tq, tkv), 1)
            if chunk == 1:
                allowed = col <= row
            else:
                allowed = (col // chunk) <= (row // chunk)
        for h in range(H):
            sl = slice(h * D, (h + 1) * D)
            # contract last dims directly (no k transpose)
            s = jax.lax.dot_general(q[:, sl], k[:, sl], (((1,), (1,)), ((), ())),
                                    preferred_element_type=jnp.float32)
            if masked:
                s = jnp.where(allowed, s, neg)
            m_prev = m_sc[h]                                       # (tq, 1)
            m_new = jnp.maximum(m_prev, jnp.max(s, axis=-1, keepdims=True))
            a = jnp.exp(m_prev - m_new)                            # (tq, 1)
            p = jnp.exp(s - m_new)                                 # (tq, tkv) f32
            sum_p = jnp.sum(p, axis=-1, keepdims=True)             # (tq, 1)
            pv = jnp.dot(p.astype(v.dtype), v[:, sl],
                         preferred_element_type=jnp.float32)       # (tq, D) f32
            # lane-dense running stats: denominator broadcast across this head's D lanes
            l_sc[:, sl] = a * l_sc[:, sl] + sum_p
            acc_sc[:, sl] = a * acc_sc[:, sl] + pv
            m_sc[h] = m_new

    # A tile needs masking iff its last kv chunk extends past the tile's first q chunk.
    needs_mask = ((ki * tkv + tkv - 1) // chunk) > ((qi * tq) // chunk)

    @pl.when(needs_mask)
    def _masked():
        attend(True)

    @pl.when(jnp.logical_not(needs_mask))
    def _unmasked():
        attend(False)

    # Last kv tile this q tile can see under the chunk-wise causal mask.
    last_ki = jnp.minimum(
        nkv - 1, (((qi * tq + tq - 1) // chunk) * chunk + chunk - 1) // tkv)

    @pl.when(ki == last_ki)
    def _finalize():
        attn = acc_sc[...] / l_sc[...]                             # exact reciprocal
        # residual add
        y = attn + xres_ref[0].astype(jnp.float32)
        # LayerNorm2
        mu = jnp.mean(y, axis=-1, keepdims=True)
        yc = y - mu
        var = jnp.mean(yc * yc, axis=-1, keepdims=True)
        yn = yc * jax.lax.rsqrt(var + eps)
        yn = yn * g2_ref[...].astype(jnp.float32) + b2_ref[...].astype(jnp.float32)
        # FiLM conditioning: x * (1 + alpha) + beta
        ab = ab_ref[...].astype(jnp.float32)                       # (1, 2E)
        out = yn * (1.0 + ab[:, :E]) + ab[:, E:]
        o_ref[0] = out.astype(o_ref.dtype)                         # lane-dense E-wide store


def flash_attention_block(qkv, x, ab, g2, b2, *, n_heads, chunk, tq=None, tkv=None):
    B, N, E3 = qkv.shape
    E = E3 // 3
    H = n_heads
    D = E // H
    tq = tq or _pick_tile(N, 256)
    tkv = tkv or _pick_tile(N, 256)
    nq, nkv = N // tq, N // tkv
    scale = 1.0 / math.sqrt(D)

    # Host-side flattened triangular (qi, ki) step table: causally-dead kv tiles are
    # neither DMA'd nor iterated. Tables live in SMEM via scalar prefetch.
    qi_list, ki_list = [], []
    for qi in range(nq):
        last_q_chunk = (qi * tq + tq - 1) // chunk
        last_ki = min(nkv - 1, (last_q_chunk * chunk + chunk - 1) // tkv)
        for ki in range(last_ki + 1):
            qi_list.append(qi)
            ki_list.append(ki)
    qi_tbl = jnp.asarray(qi_list, jnp.int32)
    ki_tbl = jnp.asarray(ki_list, jnp.int32)
    steps = len(qi_list)

    kernel = functools.partial(
        _flash_attn_kernel, H=H, D=D, E=E, scale=scale,
        tq=tq, tkv=tkv, chunk=chunk, nkv=nkv, eps=_LN_EPS, neg=_NEG)

    return pl.pallas_call(
        kernel,
        out_shape=jax.ShapeDtypeStruct((B, N, E), x.dtype),
        grid_spec=pltpu.PrefetchScalarGridSpec(
            num_scalar_prefetch=2,
            grid=(B, steps),
            in_specs=[
                pl.BlockSpec((1, tq, E), lambda b, s, qt, kt: (b, qt[s], 0)),   # q cols of qkv
                pl.BlockSpec((1, tkv, E), lambda b, s, qt, kt: (b, kt[s], 1)),  # k cols of qkv
                pl.BlockSpec((1, tkv, E), lambda b, s, qt, kt: (b, kt[s], 2)),  # v cols of qkv
                pl.BlockSpec((1, tq, E), lambda b, s, qt, kt: (b, qt[s], 0)),   # residual x
                pl.BlockSpec((1, 2 * E), lambda b, s, qt, kt: (b, 0)),          # alpha|beta
                pl.BlockSpec((1, E), lambda b, s, qt, kt: (0, 0)),              # LN2 gamma
                pl.BlockSpec((1, E), lambda b, s, qt, kt: (0, 0)),              # LN2 beta
            ],
            out_specs=pl.BlockSpec((1, tq, E), lambda b, s, qt, kt: (b, qt[s], 0)),
            scratch_shapes=[
                pltpu.VMEM((H, tq, 1), jnp.float32),   # running max (per head)
                pltpu.VMEM((tq, E), jnp.float32),      # running denom, lane-dense broadcast
                pltpu.VMEM((tq, E), jnp.float32),      # running output acc, lane-dense
            ],
        ),
        compiler_params=pltpu.CompilerParams(
            dimension_semantics=("parallel", "arbitrary"),
            vmem_limit_bytes=_VMEM_LIMIT),
    )(qi_tbl, ki_tbl, qkv, qkv, qkv, x, ab, g2, b2)


# ----------------------------------------------------------------------------
# DecoderBlock forward (weights stored as (in, out); math identical to the PyTorch module)
# ----------------------------------------------------------------------------
def decoder_block_forward(x, cond, params, *, n_heads, min_chunk_size=1, compute_dtype=None):
    B, N, E = x.shape
    cdt = compute_dtype or x.dtype          # bf16 here -> bf16 MXU operands / activations
    xc = x.astype(cdt)
    x2d = xc.reshape(B * N, E)

    # K1: qkv = LayerNorm1(x) @ W_qkv   (no bias, LN fused)
    qkv2d = ln_matmul(
        x2d, params["w_qkv"].astype(cdt),
        ln_params=(params["g1"].reshape(1, E), params["b1"].reshape(1, E)),
        out_dtype=cdt)
    qkv = qkv2d.reshape(B, N, 3 * E)

    # FiLM projection of cond -> (B, 2E) = [alpha | beta]; tiny matmul, plain XLA.
    ab = (cond @ params["w_cond"] + params["b_cond"]).astype(jnp.float32)

    # K3: flash attention + residual + LayerNorm2 + conditioning (fused)
    x3 = flash_attention_block(
        qkv, xc, ab,
        params["g2"].reshape(1, E), params["b2"].reshape(1, E),
        n_heads=n_heads, chunk=min_chunk_size)
    x3_2d = x3.reshape(B * N, E)

    # K4: h = GELU(LayerNorm3(x3) @ W1 + b1)
    h = ln_matmul(
        x3_2d, params["w_fc1"].astype(cdt), params["b_fc1"].reshape(1, -1),
        ln_params=(params["g3"].reshape(1, E), params["b3"].reshape(1, E)),
        activation="gelu", out_dtype=cdt)

    # K5: out = h @ W2 + b2 + x3   (final residual fused; K tiled when hidden is large)
    out2d = ln_matmul(h, params["w_fc2"].astype(cdt), params["b_fc2"].reshape(1, -1),
                      residual=x3_2d, out_dtype=x.dtype)
    return out2d.reshape(B, N, E)


# ----------------------------------------------------------------------------
# Pure-JAX reference (ground truth for verification)
# ----------------------------------------------------------------------------
def reference_decoder_block(x, cond, params, *, n_heads, min_chunk_size=1):
    B, N, E = x.shape
    H, D = n_heads, E // n_heads

    def ln(v, g, b):
        mu = jnp.mean(v, axis=-1, keepdims=True)
        var = jnp.mean((v - mu) ** 2, axis=-1, keepdims=True)
        return (v - mu) * jax.lax.rsqrt(var + _LN_EPS) * g + b

    h1 = ln(x, params["g1"], params["b1"])
    qkv = h1 @ params["w_qkv"]
    q, k, v = jnp.split(qkv, 3, axis=-1)

    def split_heads(t):
        return t.reshape(B, N, H, D).transpose(0, 2, 1, 3)

    q, k, v = map(split_heads, (q, k, v))
    idx = jnp.arange(N)
    allowed = (idx[None, :] // min_chunk_size) <= (idx[:, None] // min_chunk_size)
    s = jnp.einsum("bhqd,bhkd->bhqk", q, k) / jnp.sqrt(jnp.float32(D))
    s = jnp.where(allowed[None, None], s, -jnp.inf)
    p = jax.nn.softmax(s, axis=-1)
    attn = jnp.einsum("bhqk,bhkd->bhqd", p, v)
    attn = attn.transpose(0, 2, 1, 3).reshape(B, N, E)

    x2 = ln(attn + x, params["g2"], params["b2"])
    ab = cond @ params["w_cond"] + params["b_cond"]
    alpha, beta = jnp.split(ab, 2, axis=-1)
    x3 = x2 * (1.0 + alpha[:, None, :]) + beta[:, None, :]

    h = jax.nn.gelu(ln(x3, params["g3"], params["b3"]) @ params["w_fc1"]
                    + params["b_fc1"], approximate=True)
    return h @ params["w_fc2"] + params["b_fc2"] + x3


if __name__ == "__main__":
    # accurate f32 matmuls in the pure-JAX reference (TPU default would silently use bf16)
    jax.config.update("jax_default_matmul_precision", "highest")

    # DecoderBlock(embed_dim=128, cond_dim=32, mlp_multiplier=2) -> n_heads = 128 // 64 = 2
    B, N, E = 2, 16, 128
    cond_dim = 32
    mlp_mult = 2
    hidden = mlp_mult * E
    n_heads = E // 64
    min_chunk_size = 1
    dtype = jnp.float32

    key = jax.random.PRNGKey(0)
    ks = jax.random.split(key, 16)

    def w_init(k, fan_in, shape):
        return (jax.random.normal(k, shape, dtype) / np.sqrt(fan_in)).astype(dtype)

    params = {
        "g1": 1.0 + 0.1 * jax.random.normal(ks[2], (E,), dtype),
        "b1": 0.1 * jax.random.normal(ks[3], (E,), dtype),
        "g2": 1.0 + 0.1 * jax.random.normal(ks[4], (E,), dtype),
        "b2": 0.1 * jax.random.normal(ks[5], (E,), dtype),
        "g3": 1.0 + 0.1 * jax.random.normal(ks[6], (E,), dtype),
        "b3": 0.1 * jax.random.normal(ks[7], (E,), dtype),
        "w_qkv": w_init(ks[8], E, (E, 3 * E)),            # (in, out) layout
        "w_cond": w_init(ks[9], cond_dim, (cond_dim, 2 * E)),
        "b_cond": 0.1 * jax.random.normal(ks[10], (2 * E,), dtype),
        "w_fc1": w_init(ks[11], E, (E, hidden)),
        "b_fc1": 0.1 * jax.random.normal(ks[12], (hidden,), dtype),
        "w_fc2": w_init(ks[13], hidden, (hidden, E)),
        "b_fc2": 0.1 * jax.random.normal(ks[14], (E,), dtype),
    }

    x = jax.random.normal(ks[0], (B, N, E), dtype)
    cond = jax.random.normal(ks[1], (B, cond_dim), dtype)

    # --- f32 path: main correctness check -----------------------------------
    out = decoder_block_forward(x, cond, params, n_heads=n_heads,
                                min_chunk_size=min_chunk_size)
    out = jax.block_until_ready(out)
    ref = reference_decoder_block(x, cond, params, n_heads=n_heads,
                                  min_chunk_size=min_chunk_size)
    np.testing.assert_allclose(np.asarray(out), np.asarray(ref), rtol=1e-2, atol=1e-2)

    # --- K-tiled matmul path (accumulator across a K grid axis) -------------
    xt = jax.random.normal(ks[15], (32, hidden), jnp.float32)
    wt = w_init(ks[14], hidden, (hidden, E))
    bt = 0.1 * jax.random.normal(ks[13], (E,), jnp.float32)
    rt = jax.random.normal(ks[12], (32, E), jnp.float32)
    yt = ln_matmul(xt, wt, bt.reshape(1, -1), residual=rt, tk=128)
    yt = jax.block_until_ready(yt)
    np.testing.assert_allclose(np.asarray(yt), np.asarray(xt @ wt + bt + rt),
                               rtol=2e-3, atol=2e-3)

    # --- bf16 compute path (bf16 MXU operands / activations, f32 accumulation) ---
    out_bf = decoder_block_forward(x, cond, params, n_heads=n_heads,
                                   min_chunk_size=min_chunk_size,
                                   compute_dtype=jnp.bfloat16)
    out_bf = jax.block_until_ready(out_bf)
    np.testing.assert_allclose(np.asarray(out_bf.astype(jnp.float32)), np.asarray(ref),
                               rtol=0.2, atol=0.2)

    print("KERNEL_OK")
</pallas_src>

<mosaic_0001>
module attributes {stable_mosaic.version = 11 : i64} {
  func.func @_ln_mm_kernel(%arg0: i32, %arg1: i32, %arg2: i32, %arg3: memref<32x128xf32, #tpu.memory_space<vmem>>, %arg4: memref<1x128xf32, #tpu.memory_space<vmem>>, %arg5: memref<1x128xf32, #tpu.memory_space<vmem>>, %arg6: memref<128x384xf32, #tpu.memory_space<vmem>>, %arg7: memref<32x384xf32, #tpu.memory_space<vmem>>) attributes {dimension_semantics = [#tpu.dimension_semantics<parallel>, #tpu.dimension_semantics<parallel>, #tpu.dimension_semantics<arbitrary>], iteration_bounds = array<i64: 1, 1, 1>, scalar_prefetch = 0 : i64, scratch_operands = 0 : i64, tpu.core_type = #tpu.core_type<tc>, window_params = [{transform_indices = @transform_0, window_bounds = array<i64: 32, 128>}, {pipeline_mode = #tpu.pipeline_mode<synchronous>, transform_indices = @transform_1, window_bounds = array<i64: 1, 128>}, {pipeline_mode = #tpu.pipeline_mode<synchronous>, transform_indices = @transform_2, window_bounds = array<i64: 1, 128>}, {transform_indices = @transform_3, window_bounds = array<i64: 128, 384>}, {transform_indices = @transform_4, window_bounds = array<i64: 32, 384>}]} {
    %c0 = arith.constant 0 : index
    %c0_0 = arith.constant 0 : index
    %0 = vector.load %arg3[%c0, %c0_0] : memref<32x128xf32, #tpu.memory_space<vmem>>, vector<32x128xf32>
    %cst = arith.constant dense<0.000000e+00> : vector<32xf32>
    %1 = vector.multi_reduction <add>, %0, %cst [1] : vector<32x128xf32> to vector<32xf32>
    %2 = vector.shape_cast %1 : vector<32xf32> to vector<32x1xf32>
    %cst_1 = arith.constant 1.280000e+02 : f32
    %3 = vector.broadcast %cst_1 : f32 to vector<32x1xf32>
    %4 = arith.divf %2, %3 : vector<32x1xf32>
    %5 = vector.broadcast %4 : vector<32x1xf32> to vector<32x128xf32>
    %6 = arith.subf %0, %5 : vector<32x128xf32>
    %7 = arith.mulf %6, %6 : vector<32x128xf32>
    %cst_2 = arith.constant dense<0.000000e+00> : vector<32xf32>
    %8 = vector.multi_reduction <add>, %7, %cst_2 [1] : vector<32x128xf32> to vector<32xf32>
    %9 = vector.shape_cast %8 : vector<32xf32> to vector<32x1xf32>
    %cst_3 = arith.constant 1.280000e+02 : f32
    %10 = vector.broadcast %cst_3 : f32 to vector<32x1xf32>
    %11 = arith.divf %9, %10 : vector<32x1xf32>
    %cst_4 = arith.constant 9.99999974E-6 : f32
    %12 = vector.broadcast %cst_4 : f32 to vector<32x1xf32>
    %13 = arith.addf %11, %12 : vector<32x1xf32>
    %14 = math.rsqrt %13 : vector<32x1xf32>
    %15 = vector.broadcast %14 : vector<32x1xf32> to vector<32x128xf32>
    %16 = arith.mulf %6, %15 : vector<32x128xf32>
    %c0_5 = arith.constant 0 : index
    %c0_6 = arith.constant 0 : index
    %17 = vector.load %arg4[%c0_5, %c0_6] : memref<1x128xf32, #tpu.memory_space<vmem>>, vector<1x128xf32>
    %18 = vector.broadcast %17 : vector<1x128xf32> to vector<32x128xf32>
    %19 = arith.mulf %16, %18 : vector<32x128xf32>
    %c0_7 = arith.constant 0 : index
    %c0_8 = arith.constant 0 : index
    %20 = vector.load %arg5[%c0_7, %c0_8] : memref<1x128xf32, #tpu.memory_space<vmem>>, vector<1x128xf32>
    %21 = vector.broadcast %20 : vector<1x128xf32> to vector<32x128xf32>
    %22 = arith.addf %19, %21 : vector<32x128xf32>
    %c0_9 = arith.constant 0 : index
    %c0_10 = arith.constant 0 : index
    %23 = vector.load %arg6[%c0_9, %c0_10] : memref<128x384xf32, #tpu.memory_space<vmem>>, vector<128x384xf32>
    %cst_11 = arith.constant dense<0.000000e+00> : vector<32x384xf32>
    %24 = tpu.matmul %22, %23, %cst_11 {dimension_numbers = #tpu.dot_dimension_numbers<[1], [0], [0], [1], [0, 0, 1, 1], [], []>, precision = #tpu.contract_precision<fp32>} : vector<32x128xf32>, vector<128x384xf32>, vector<32x384xf32> -> vector<32x384xf32>
    %c0_12 = arith.constant 0 : index
    %c0_13 = arith.constant 0 : index
    %25 = vector.load %arg7[%c0_12, %c0_13] : memref<32x384xf32, #tpu.memory_space<vmem>>, vector<32x384xf32>
    tpu.vector_store %arg7[%c0_12, %c0_13], %24 {strides = array<i32>} : memref<32x384xf32, #tpu.memory_space<vmem>>, vector<32x384xf32>,
    return
  }
  func.func @transform_0(%arg0: i32, %arg1: i32, %arg2: i32) -> (i32, i32) {
    %c0_i32 = arith.constant 0 : i32
    return %arg0, %arg2 : i32, i32
  }
  func.func @transform_1(%arg0: i32, %arg1: i32, %arg2: i32) -> (i32, i32) {
    %c0_i32 = arith.constant 0 : i32
    %c0_i32_0 = arith.constant 0 : i32
    %c0_i32_1 = arith.constant 0 : i32
    return %c0_i32, %c0_i32_0 : i32, i32
  }
  func.func @transform_2(%arg0: i32, %arg1: i32, %arg2: i32) -> (i32, i32) {
    %c0_i32 = arith.constant 0 : i32
    %c0_i32_0 = arith.constant 0 : i32
    %c0_i32_1 = arith.constant 0 : i32
    return %c0_i32, %c0_i32_0 : i32, i32
  }
  func.func @transform_3(%arg0: i32, %arg1: i32, %arg2: i32) -> (i32, i32) {
    %c0_i32 = arith.constant 0 : i32
    return %arg2, %arg1 : i32, i32
  }
  func.func @transform_4(%arg0: i32, %arg1: i32, %arg2: i32) -> (i32, i32) {
    %c0_i32 = arith.constant 0 : i32
    return %arg0, %arg1 : i32, i32
  }
}

</mosaic_0001>

<bundles_post_ra>
// kernel: tpu_custom_call.1
= control target key start
LH: loop header
LB: loop body
LE: loop exit
PB: predicated region body
PF: predicated region fallthrough
CT: control target
= control target key end

     0   :  { %9 = vsyncpa [#allocation3], 0  ;;  %s4173_s0 = inlined_call_operand.hbm [shape: f32[32,128], index: 0, kind: input, shape index: {}]   ;;  %s4174_s1 = inlined_call_operand.hbm [shape: f32[1,128], index: 1, kind: input, shape index: {}]   ;;  %s4175_s2 = inlined_call_operand.hbm [shape: f32[1,128], index: 2, kind: input, shape index: {}]   ;;  %s4176_s3 = inlined_call_operand.hbm [shape: f32[128,384], index: 3, kind: input, shape index: {}]   ;;  %s4177_s4 = inlined_call_operand.hbm [shape: f32[32,384], index: 4, kind: output, shape index: {}]  }
   0x1   :  { %10 = vsyncpa [#allocation6], 0 }
   0x2   :  { %11 = vsyncpa [#allocation9], 0 }
   0x3   :  { %12 = vsyncpa [#allocation4], 0  ;;  %s2921_s15 = smov [#allocation5]   ;;  %s2922_s17 = smov [#allocation2]  }
   0x4   :  { %s31_s16 = sshll.u32 %s2921_s15, 4  ;;  %s18_s18 = sshll.u32 %s2922_s17, 4  ;;  %s32_s16 = int_to_ptr.vmem [resolvable:$true] %s31_s16  ;;  %s2956_s18 = int_to_ptr.vmem [resolvable:$true] %s18_s18 }
   0x5   :  { %s2803_s21 = scalar_lea.hbm %s4174_s1, 16 }
   0x6   :  { %p2804_p0 = scmp.ne.s32.totalorder %s4174_s1, %s2803_s21  ;;  %p2807_p1 = scmp.lt.u32.totalorder %s2803_s21, %s4174_s1 }
   0x8   :  { %p2809_p2 = pnand %p2807_p1, %p2804_p0 }
   0xa   :  { %2812 = shalt.err (!%p2809_p2)
}
   0xb   :  { %s2813_s26 = scalar_lea.vmem %s32_s16, 16  ;;  %s2817_s27 = scalar_lea.vmem %s32_s16, 32 }
   0xc   :  { %p2814_p3 = scmp.ne.s32.totalorder %s32_s16, %s2813_s26  ;;  %p2818_p4 = scmp.lt.s32.totalorder %s32_s16, %s32_s16 }
   0xd   :  { %p2819_p5 = scmp.lt.s32.totalorder %s2817_s27, %s2813_s26 }
   0xf   :  { %p2820_p6 = por %p2819_p5, %p2818_p4 }
  0x11   :  { %p2821_p7 = pnand %p2820_p6, %p2814_p3 }
  0x13   :  { %2824 = shalt.err (!%p2821_p7)
}
  0x14   :  { %34 = dma.hbm_to_vmem [thread:$0]  %s4174_s1, 16, %s32_s16, [#allocation6]  }
  0x15   :  { %s2825_s6 = scalar_lea.hbm %s4173_s0, 512 }
  0x16   :  { %p2826_p8 = scmp.ne.s32.totalorder %s4173_s0, %s2825_s6  ;;  %p2829_p9 = scmp.lt.u32.totalorder %s2825_s6, %s4173_s0 }
  0x18   :  { %p2831_p10 = pnand %p2829_p9, %p2826_p8 }
  0x1a   :  { %2834 = shalt.err (!%p2831_p10)
}
  0x1b   :  { %s2835_s11 = scalar_lea.vmem %s2956_s18, 512  ;;  %p2840_p12 = scmp.lt.s32.totalorder %s2956_s18, %s2956_s18 }
  0x1c   :  { %p2836_p11 = scmp.ne.s32.totalorder %s2956_s18, %s2835_s11  ;;  %p2841_p13 = scmp.lt.s32.totalorder %s2835_s11, %s2835_s11 }
  0x1e   :  { %p2842_p0 = por %p2841_p13, %p2840_p12 }
  0x20   :  { %p2843_p1 = pnand %p2842_p0, %p2836_p11 }
  0x22   :  { %2846 = shalt.err (!%p2843_p1)
}
  0x23   :  { %s2923_s1 = smov 128   ;;  %s2924_s12 = smov 8  }
  0x24   :  { %24 = dma.hbm_to_vmem [thread:$0]  %s4173_s0, 512, %s2956_s18, [#allocation3], %s2923_s1, %s2923_s1, %s2924_s12  }
  0x25   :  { %s2925_s15 = smov [#allocation7]   ;;  %s2926_s17 = smov [#allocation8]  }
  0x26   :  { %s41_s16 = sshll.u32 %s2925_s15, 4  ;;  %s50_s19 = sshll.u32 %s2926_s17, 4  ;;  %s42_s16 = int_to_ptr.vmem [resolvable:$true] %s41_s16  ;;  %s2987_s19 = int_to_ptr.vmem [resolvable:$true] %s50_s19 }
  0x27   :  { %s2847_s22 = scalar_lea.hbm %s4175_s2, 16 }
  0x28   :  { %p2848_p2 = scmp.ne.s32.totalorder %s4175_s2, %s2847_s22  ;;  %p2851_p3 = scmp.lt.u32.totalorder %s2847_s22, %s4175_s2 }
  0x2a   :  { %p2853_p4 = pnand %p2851_p3, %p2848_p2 }
  0x2c   :  { %2856 = shalt.err (!%p2853_p4)
}
  0x2d   :  { %s2857_s0 = scalar_lea.vmem %s42_s16, 16  ;;  %s2861_s18 = scalar_lea.vmem %s42_s16, 32 }
  0x2e   :  { %p2858_p5 = scmp.ne.s32.totalorder %s42_s16, %s2857_s0  ;;  %p2862_p6 = scmp.lt.s32.totalorder %s42_s16, %s42_s16 }
  0x2f   :  { %p2863_p7 = scmp.lt.s32.totalorder %s2861_s18, %s2857_s0 }
  0x31   :  { %p2864_p8 = por %p2863_p7, %p2862_p6 }
  0x33   :  { %p2865_p9 = pnand %p2864_p8, %p2858_p5 }
  0x35   :  { %2868 = shalt.err (!%p2865_p9)
}
  0x36   :  { %44 = dma.hbm_to_vmem [thread:$0]  %s4175_s2, 16, %s42_s16, [#allocation6]  }
  0x37   :  { %s2869_s5 = scalar_lea.hbm %s4176_s3, 6144 }
  0x38   :  { %p2870_p10 = scmp.ne.s32.totalorder %s4176_s3, %s2869_s5  ;;  %p2873_p11 = scmp.lt.u32.totalorder %s2869_s5, %s4176_s3 }
  0x3a   :  { %p2875_p12 = pnand %p2873_p11, %p2870_p10 }
  0x3c   :  { %2878 = shalt.err (!%p2875_p12)
}
  0x3d   :  { %s2879_s10 = scalar_lea.vmem %s2987_s19, 6144  ;;  %p2884_p0 = scmp.lt.s32.totalorder %s2987_s19, %s2987_s19 }
  0x3e   :  { %p2880_p13 = scmp.ne.s32.totalorder %s2987_s19, %s2879_s10  ;;  %p2885_p1 = scmp.lt.s32.totalorder %s2879_s10, %s2879_s10 }
  0x40   :  { %p2886_p2 = por %p2885_p1, %p2884_p0 }
  0x42   :  { %p2887_p3 = pnand %p2886_p2, %p2880_p13 }
  0x44   :  { %2890 = shalt.err (!%p2887_p3)
}
  0x45   :  { %s2927_s2 = smov 384   ;;  %s2928_s11 = smov 24  }
  0x46   :  { %56 = dma.hbm_to_vmem [thread:$0]  %s4176_s3, 6144, %s2987_s19, [#allocation9], %s2927_s2, %s2927_s2, %s2928_s11  }
  0x47   :  { %2913 = dma.done.wait [#allocation3], 512  }
  0x48   :  { %2914 = vsyncadd [#allocation3], 4294966784 }
  0x49   :  { %2915 = dma.done.wait [#allocation6], 32  }
  0x4a   :  { %2916 = vsyncadd [#allocation6], 4294967264 }
  0x4b   :  { %2917 = dma.done.wait [#allocation9], 6144  }
  0x4c   :  { %2918 = vsyncadd [#allocation9], 4294961152  ;;  %v69_v0 = vld [vmem:[#allocation2] sm:$0xff]  ;;  %v71_v1 = vld [vmem:[#allocation2 + $0x10] sm:$0xff]  ;;  %s2930_s3 = smov [#allocation10]  }
  0x4d   :  { %73 = vadd.xlane.f32.xlu0 %v69_v0  ;;  %77 = vadd.xlane.f32.xlu1 %v71_v1  ;;  %v70_v2 = vld [vmem:[#allocation2 + $0x8] sm:$0xff]  ;;  %v72_v3 = vld [vmem:[#allocation2 + $0x18] sm:$0xff]  ;;  %s1977_s13 = sshll.u32 %s2930_s3, 4  ;;  %s1978_s13 = int_to_ptr.vmem [resolvable:$true] %s1977_s13 }
  0x4e   :  { %v141_v4 = vld [vmem:[#allocation8 + $0x8] sm:$0xff]  ;;  %v144_v5 = vld [vmem:[#allocation8 + $0x20] sm:$0xff]  ;;  %v143_v9 = vld [vmem:[#allocation8 + $0x18] sm:$0xff]  ;;  %s2891_s14 = scalar_lea.vmem %s1978_s13, 1536  ;;  %p2896_p5 = scmp.lt.s32.totalorder %s1978_s13, %s1978_s13 }
  0x4f   :  { %v140_v6 = vld [vmem:[#allocation8] sm:$0xff]  ;;  %v188_v7 = vand.u32 4294901760, %v141_v4  ;;  %v192_v8 = vand.u32 4294901760, %v144_v5  ;;  %v194_v11 = vand.u32 4294901760, %v143_v9  ;;  %v3051_v34 = vld [vmem:[#allocation8 + $0x38] sm:$0xff]  ;;  %v3053_v35 = vld [vmem:[#allocation8 + $0x50] sm:$0xff]  ;;  %p2892_p4 = scmp.ne.s32.totalorder %s1978_s13, %s2891_s14  ;;  %p2897_p6 = scmp.lt.s32.totalorder %s2891_s14, %s2891_s14 }
  0x50   :  { %v190_v10 = vand.u32 4294901760, %v140_v6  ;;  %v3055_v36 = vld [vmem:[#allocation8 + $0x10] sm:$0xff]  ;;  %v196_v37 = vand.u32 4294901760, %v3051_v34  ;;  %v200_v38 = vand.u32 4294901760, %v3053_v35  ;;  %v3059_v39 = vld [vmem:[#allocation8 + $0x28] sm:$0xff]  ;;  %v3090_v50 = vld [vmem:[#allocation8 + $0x80] sm:$0xff] }
  0x51   :  { %75 = vadd.xlane.f32.xlu0 %v70_v2  ;;  %79 = vadd.xlane.f32.xlu1 %v72_v3  ;;  %v3021_v12 = vpack.c.bf16 %v192_v8, %v188_v7  ;;  %v3023_v13 = vsub.f32 %v141_v4, %v188_v7  ;;  %v3025_v14 = vsub.f32 %v144_v5, %v192_v8  ;;  %v4183_v40 = vand.u32 4294901760, %v3055_v36  ;;  %v3062_v41 = vld [vmem:[#allocation8 + $0x30] sm:$0xff]  ;;  %v3064_v42 = vld [vmem:[#allocation8 + $0x48] sm:$0xff]  ;;  %v3092_v51 = vld [vmem:[#allocation8 + $0x40] sm:$0xff]  ;;  %p2898_p7 = por %p2897_p6, %p2896_p5 }
  0x52   :  { %v3027_v15 = vsub.f32 %v140_v6, %v190_v10  ;;  %v3029_v16 = vpack.c.bf16 %v194_v11, %v190_v10  ;;  %v3031_v17 = vsub.f32 %v143_v9, %v194_v11  ;;  %v4182_v43 = vand.u32 4294901760, %v3059_v39  ;;  %v3088_v49 = vld [vmem:[#allocation8 + $0x68] sm:$0xff]  ;;  %v3098_v54 = vld [vmem:[#allocation8 + $0x58] sm:$0xff]  ;;  %v3101_v56 = vld [vmem:[#allocation8 + $0x60] sm:$0xff] }
  0x53   :  { %4343 = vst [vmem:[#allocation15_spill] sm:$0xff] %v3021_v12  ;;  %4344 = vst [vmem:[#allocation16_spill] sm:$0xff] %v3023_v13  ;;  %2342 = vmatprep.subr.bf16.mxu0 %v3021_v12  ;;  %v198_v44 = vand.u32 4294901760, %v3062_v41  ;;  %v202_v45 = vand.u32 4294901760, %v3064_v42  ;;  %v3073_v46 = vpack.c.bf16 %v200_v38, %v196_v37  ;;  %v4197_v52 = vand.u32 4294901760, %v3088_v49  ;;  %v3103_v57 = vld [vmem:[#allocation8 + $0x78] sm:$0xff]  ;;  %p2899_p8 = pnand %p2898_p7, %p2892_p4 }
  0x54   :  { %4345 = vst [vmem:[#allocation17_spill] sm:$0xff] %v3025_v14  ;;  %4346 = vst [vmem:[#allocation18_spill] sm:$0xff] %v3029_v16  ;;  %2344 = vmatpush1.bf16.msra.mxu0 %v3029_v16  ;;  %v3079_v47 = vpack.c.bf16 %v4182_v43, %v4183_v40  ;;  %v4196_v53 = vand.u32 4294901760, %v3090_v50  ;;  %v4181_v55 = vand.u32 4294901760, %v3092_v51  ;;  %v4180_v58 = vand.u32 4294901760, %v3098_v54  ;;  %v3136_v5 = vld [vmem:[#allocation8 + $0x88] sm:$0xff] }
  0x55   :  { %4351 = vst [vmem:[#allocation23_spill] sm:$0xff] %v3073_v46  ;;  %v3085_v48 = vpack.c.bf16 %v202_v45, %v198_v44  ;;  %2346 = vmatprep.subr.bf16.mxu0 %v3073_v46  ;;  %v4195_v59 = vand.u32 4294901760, %v3101_v56  ;;  %v4194_v60 = vand.u32 4294901760, %v3103_v57  ;;  %v3139_v7 = vld [vmem:[#allocation8 + $0x90] sm:$0xff]  ;;  %v3141_v8 = vld [vmem:[#allocation8 + $0xa8] sm:$0xff]  ;;  %v4178_v9 = vand.u32 4294901760, %v3136_v5 }
  0x56   :  { %4352 = vst [vmem:[#allocation24_spill] sm:$0xff] %v3079_v47  ;;  %2534 = vmatprep.subr.bf16.mxu1 %v3079_v47  ;;  %v3113_v61 = vpack.c.bf16 %v4196_v53, %v4197_v52  ;;  %v3119_v62 = vpack.c.bf16 %v4180_v58, %v4181_v55  ;;  %v4185_v10 = vand.u32 4294901760, %v3139_v7  ;;  %v4184_v11 = vand.u32 4294901760, %v3141_v8  ;;  %v3295_v46 = vld [vmem:[#allocation8 + $0x130] sm:$0xff]  ;;  %v3306_v16 = vld [vmem:[#allocation8 + $0x148] sm:$0xff] }
  0x57   :  { %4353 = vst [vmem:[#allocation25_spill] sm:$0xff] %v3085_v48  ;;  %2536 = vmatpush3.bf16.msra.mxu1 %v3079_v47  ;;  %v3125_v63 = vpack.c.bf16 %v4194_v60, %v4195_v59  ;;  %v3231_v53 = vsub.f32 %v3051_v34, %v196_v37  ;;  %v3236_v52 = vsub.f32 %v3053_v35, %v200_v38  ;;  %v186_v47 = vld [vmem:[#allocation8 + $0x170] sm:$0xff]  ;;  %v4384_v12 = vand.u32 4294901760, %v3141_v8 }
  0x58   :  { %2348 = vmatpush1.bf16.msra.mxu0 %v3085_v48  ;;  %4354 = vst [vmem:[#allocation26_spill] sm:$0xff] %v3113_v61  ;;  %4355 = vst [vmem:[#allocation27_spill] sm:$0xff] %v3119_v62  ;;  %2538 = vmatprep.subr.bf16.mxu1 %v3119_v62  ;;  %v183_v48 = vld [vmem:[#allocation8 + $0x158] sm:$0xff] }
  0x59   :  { %4356 = vst [vmem:[#allocation28_spill] sm:$0xff] %v3125_v63  ;;  %2350 = vmatprep.subr.bf16.mxu0 %v3113_v61  ;;  %4363 = vst [vmem:[#allocation35_spill] sm:$0xff] %v3231_v53 }
  0x5a   :  { %4364 = vst [vmem:[#allocation36_spill] sm:$0xff] %v3236_v52 }
  0x5b   :  { %2540 = vmatpush3.bf16.msra.mxu1 %v3119_v62  ;;  %v4374_v62 = vand.u32 4294901760, %v3090_v50 }
  0x5c   :  { %2352 = vmatpush1.bf16.msra.mxu0 %v3125_v63  ;;  %v4373_v63 = vand.u32 4294901760, %v3088_v49 }
  0xda   :  { %v74_v18 = vpop.xlane.xlu0 %73  ;;  %v78_v19 = vpop.xlane.xlu1 %77 }
  0xdb   :  { %v82_v20 = vmul.f32 0.0078125, %v74_v18  ;;  %v84_v21 = vmul.f32 0.0078125, %v78_v19 }
  0xdd   :  { %v3035_v22 = vsub.f32 %v69_v0, %v82_v20  ;;  %v3037_v23 = vsub.f32 %v71_v1, %v84_v21  ;;  %v3127_v0 = vld [vmem:[#allocation8 + $0x98] sm:$0xff]  ;;  %v3129_v1 = vld [vmem:[#allocation8 + $0xb0] sm:$0xff]  ;;  %v3165_v20 = vpack.c.bf16 %v4184_v11, %v4185_v10  ;;  %v3167_v21 = vld [vmem:[#allocation8 + $0xc8] sm:$0xff] }
  0xde   :  { %v76_v24 = vpop.xlane.xlu0 %75  ;;  %v80_v25 = vpop.xlane.xlu1 %79  ;;  %v4186_v4 = vand.u32 4294901760, %v3129_v1  ;;  %v3207_v11 = vld [vmem:[#allocation8 + $0xf8] sm:$0xff]  ;;  %v3209_v10 = vld [vmem:[#allocation8 + $0x110] sm:$0xff] }
  0xdf   :  { %4347 = vst [vmem:[#allocation19_spill] sm:$0xff] %v3035_v22  ;;  %4348 = vst [vmem:[#allocation20_spill] sm:$0xff] %v3037_v23  ;;  %v83_v26 = vmul.f32 0.0078125, %v76_v24  ;;  %v90_v27 = vmul.f32 %v3035_v22, %v3035_v22  ;;  %v85_v28 = vmul.f32 0.0078125, %v80_v25  ;;  %v92_v31 = vmul.f32 %v3037_v23, %v3037_v23  ;;  %v3169_v24 = vld [vmem:[#allocation8 + $0xe0] sm:$0xff] }
  0xe0   :  { %4359 = vst [vmem:[#allocation31_spill] sm:$0xff] %v3165_v20  ;;  %v3171_v25 = vld [vmem:[#allocation8 + $0xa0] sm:$0xff] }
  0xe1   :  { %v3041_v29 = vsub.f32 %v70_v2, %v83_v26  ;;  %94 = vadd.xlane.f32.xlu0 %v90_v27  ;;  %v3043_v30 = vsub.f32 %v72_v3, %v85_v28  ;;  %v3131_v2 = vld [vmem:[#allocation8 + $0x70] sm:$0xff]  ;;  %v4191_v3 = vand.u32 4294901760, %v3127_v0  ;;  %v4188_v26 = vand.u32 4294901760, %v3167_v21  ;;  %v3176_v28 = vld [vmem:[#allocation8 + $0xb8] sm:$0xff] }
  0xe2   :  { %v4179_v6 = vand.u32 4294901760, %v3131_v2  ;;  %v4187_v27 = vand.u32 4294901760, %v3169_v24 }
  0xe3   :  { %4349 = vst [vmem:[#allocation21_spill] sm:$0xff] %v3041_v29  ;;  %4350 = vst [vmem:[#allocation22_spill] sm:$0xff] %v3043_v30  ;;  %v91_v32 = vmul.f32 %v3041_v29, %v3041_v29  ;;  %v93_v33 = vmul.f32 %v3043_v30, %v3043_v30  ;;  %v3153_v18 = vpack.c.bf16 %v4186_v4, %v4191_v3  ;;  %v3211_v4 = vld [vmem:[#allocation8 + $0xd0] sm:$0xff]  ;;  %v4381_v29 = vand.u32 4294901760, %v3127_v0 }
  0xe4   :  { %v3159_v19 = vpack.c.bf16 %v4178_v9, %v4179_v6  ;;  %v4189_v9 = vand.u32 4294901760, %v3176_v28  ;;  %v3193_v55 = vpack.c.bf16 %v4187_v27, %v4188_v26  ;;  %v4207_v27 = vand.u32 4294901760, %v3207_v11  ;;  %v3219_v3 = vld [vmem:[#allocation8 + $0xf0] sm:$0xff] }
  0xe5   :  { %98 = vadd.xlane.f32.xlu0 %v92_v31  ;;  %96 = vadd.xlane.f32.xlu1 %v91_v32  ;;  %4357 = vst [vmem:[#allocation29_spill] sm:$0xff] %v3153_v18  ;;  %v4190_v31 = vand.u32 4294901760, %v3171_v25  ;;  %v3179_v32 = vld [vmem:[#allocation8 + $0xc0] sm:$0xff]  ;;  %v4206_v26 = vand.u32 4294901760, %v3209_v10  ;;  %v230_v60 = vand.u32 4294901760, %v3219_v3  ;;  %v4366_v35 = vand.u32 4294901760, %v3211_v4 }
  0xe6   :  { %4358 = vst [vmem:[#allocation30_spill] sm:$0xff] %v3159_v19  ;;  %2354 = vmatprep.subr.bf16.mxu0 %v3153_v18  ;;  %2542 = vmatprep.subr.bf16.mxu1 %v3159_v19  ;;  %v4193_v6 = vand.u32 4294901760, %v3179_v32  ;;  %4360 = vst [vmem:[#allocation32_spill] sm:$0xff] %v3193_v55  ;;  %v3313_v22 = vsub.f32 %v3127_v0, %v4381_v29  ;;  %v3328_v30 = vsub.f32 %v3141_v8, %v4384_v12 }
  0xe7   :  { %2356 = vmatpush1.bf16.msra.mxu0 %v3165_v20  ;;  %2544 = vmatpush3.bf16.msra.mxu1 %v3159_v19  ;;  %v3199_v43 = vpack.c.bf16 %v4189_v9, %v4190_v31  ;;  %v3216_v9 = vld [vmem:[#allocation8 + $0xe8] sm:$0xff]  ;;  %v3241_v31 = vsub.f32 %v3062_v41, %v198_v44  ;;  %v3253_v34 = vpack.c.bf16 %v4206_v26, %v4207_v27  ;;  %v176_v26 = vld [vmem:[#allocation8 + $0x120] sm:$0xff]  ;;  %v179_v27 = vld [vmem:[#allocation8 + $0x138] sm:$0xff]  ;;  %v4385_v29 = vand.u32 4294901760, %v3167_v21 }
  0xe8   :  { %2358 = vmatprep.subr.bf16.mxu0 %v3193_v55  ;;  %v4367_v37 = vand.u32 4294901760, %v3216_v9  ;;  %v177_v44 = vld [vmem:[#allocation8 + $0x128] sm:$0xff]  ;;  %v3265_v55 = vld [vmem:[#allocation8 + $0x118] sm:$0xff]  ;;  %v242_v19 = vand.u32 4294901760, %v179_v27  ;;  %v3278_v20 = vsub.f32 %v3088_v49, %v4373_v63 }
  0xe9   :  { %100 = vadd.xlane.f32.xlu1 %v93_v33  ;;  %v3181_v33 = vld [vmem:[#allocation8 + $0xd8] sm:$0xff]  ;;  %4361 = vst [vmem:[#allocation33_spill] sm:$0xff] %v3199_v43  ;;  %2546 = vmatprep.subr.bf16.mxu1 %v3199_v43  ;;  %4365 = vst [vmem:[#allocation37_spill] sm:$0xff] %v3253_v34  ;;  %v3334_v0 = vsub.f32 %v3167_v21, %v4385_v29  ;;  %v4389_v21 = vand.u32 4294901760, %v3207_v11 }
  0xea   :  { %v4192_v58 = vand.u32 4294901760, %v3181_v33  ;;  %v3259_v38 = vpack.c.bf16 %v4367_v37, %v4366_v35  ;;  %4371 = vst [vmem:[#allocation41_spill] sm:$0xff] %v3265_v55  ;;  %v238_v37 = vand.u32 4294901760, %v176_v26  ;;  %v4375_v35 = vand.u32 4294901760, %v3101_v56 }
  0xeb   :  { %2548 = vmatpush3.bf16.msra.mxu1 %v3199_v43  ;;  %v4388_v12 = vand.u32 4294901760, %v3181_v33  ;;  %v3355_v29 = vsub.f32 %v3207_v11, %v4389_v21  ;;  %v3375_v11 = vsub.f32 %v179_v27, %v242_v19  ;;  %v3377_v21 = vld [vmem:[#allocation8 + $0x160] sm:$0xff] }
  0xec   :  { %v3205_v40 = vpack.c.bf16 %v4192_v58, %v4193_v6  ;;  %v3221_v58 = vld [vmem:[#allocation8 + $0x108] sm:$0xff]  ;;  %v3246_v6 = vsub.f32 %v3064_v42, %v202_v45  ;;  %4368 = vst [vmem:[#allocation38_spill] sm:$0xff] %v3259_v38  ;;  %v3263_v42 = vld [vmem:[#allocation8 + $0x100] sm:$0xff]  ;;  %v236_v45 = vand.u32 4294901760, %v177_v44  ;;  %2550 = vmatprep.subr.bf16.mxu1 %v3259_v38  ;;  %v3288_v61 = vsub.f32 %v3101_v56, %v4375_v35 }
  0xed   :  { %v234_v59 = vand.u32 4294901760, %v3221_v58  ;;  %4370 = vst [vmem:[#allocation40_spill] sm:$0xff] %v3263_v42  ;;  %v4377_v49 = vand.u32 4294901760, %v3263_v42  ;;  %v3304_v63 = vpack.c.bf16 %v242_v19, %v238_v37  ;;  %v244_v56 = vand.u32 4294901760, %v183_v48 }
  0xee   :  { %4362 = vst [vmem:[#allocation34_spill] sm:$0xff] %v3205_v40  ;;  %2360 = vmatpush1.bf16.msra.mxu0 %v3205_v40  ;;  %v180_v40 = vld [vmem:[#allocation8 + $0x140] sm:$0xff]  ;;  %v248_v35 = vand.u32 4294901760, %v186_v47  ;;  %v3349_v8 = vsub.f32 %v3181_v33, %v4388_v12  ;;  %v3369_v33 = vsub.f32 %v177_v44, %v236_v45  ;;  %v4251_v27 = vand.u32 4294901760, %v3377_v21 }
  0xef   :  { %v3261_v41 = vpack.c.bf16 %v234_v59, %v230_v60  ;;  %v240_v43 = vand.u32 4294901760, %v180_v40  ;;  %2362 = vmatprep.subr.bf16.mxu0 %v3253_v34  ;;  %2552 = vmatpush3.bf16.msra.mxu1 %v3259_v38  ;;  %v3283_v34 = vsub.f32 %v3090_v50, %v4374_v62  ;;  %v4378_v50 = vand.u32 4294901760, %v3265_v55  ;;  %4380 = vst [vmem:[#allocation44_spill] sm:$0xff] %v3304_v63 }
  0xf0   :  { %v4383_v55 = vand.u32 4294901760, %v3139_v7 }
  0xf1   :  { %4369 = vst [vmem:[#allocation39_spill] sm:$0xff] %v3261_v41  ;;  %v3273_v18 = vpack.c.bf16 %v240_v43, %v236_v45  ;;  %v3302_v62 = vpack.c.bf16 %v4378_v50, %v4377_v49  ;;  %v4382_v49 = vand.u32 4294901760, %v3129_v1  ;;  %v3371_v12 = vsub.f32 %v180_v40, %v240_v43 }
  0xf2   :  { %2364 = vmatpush1.bf16.msra.mxu0 %v3261_v41  ;;  %v4376_v41 = vand.u32 4294901760, %v3103_v57  ;;  %v3323_v42 = vsub.f32 %v3139_v7, %v4383_v55  ;;  %v4387_v55 = vand.u32 4294901760, %v3179_v32  ;;  %v4258_v45 = vand.u32 4294901760, %v3231_v53 }
  0xf3   :  { %4372 = vst [vmem:[#allocation42_spill] sm:$0xff] %v3273_v18  ;;  %2366 = vmatprep.subr.bf16.mxu0 %v3273_v18  ;;  %4379 = vst [vmem:[#allocation43_spill] sm:$0xff] %v3302_v62  ;;  %v3318_v50 = vsub.f32 %v3129_v1, %v4382_v49  ;;  %2554 = vmatprep.subr.bf16.mxu1 %v3302_v62  ;;  %v4386_v1 = vand.u32 4294901760, %v3169_v24 }
  0xf4   :  { %v3293_v38 = vsub.f32 %v3103_v57, %v4376_v41  ;;  %v182_v57 = vld [vmem:[#allocation8 + $0x150] sm:$0xff]  ;;  %v185_v41 = vld [vmem:[#allocation8 + $0x168] sm:$0xff]  ;;  %v3344_v7 = vsub.f32 %v3179_v32, %v4387_v55  ;;  %v3363_v32 = vsub.f32 %v3219_v3, %v230_v60  ;;  %v3366_v55 = vsub.f32 %v3221_v58, %v234_v59  ;;  %2556 = vmatpush3.bf16.msra.mxu1 %v3302_v62 }
  0xf5   :  { %v246_v23 = vand.u32 4294901760, %v182_v57  ;;  %v250_v18 = vand.u32 4294901760, %v185_v41  ;;  %v3339_v49 = vsub.f32 %v3169_v24, %v4386_v1  ;;  %v4390_v24 = vand.u32 4294901760, %v3209_v10 }
  0xf6   :  { %2368 = vmatpush1.bf16.msra.mxu0 %v3304_v63  ;;  %v3373_v63 = vsub.f32 %v176_v26, %v238_v37  ;;  %v3383_v60 = vsub.f32 %v183_v48, %v244_v56  ;;  %v3385_v58 = vsub.f32 %v186_v47, %v248_v35  ;;  %v4392_v59 = vand.u32 4294901760, %v3295_v46 }
  0xf7   :  { %v3360_v1 = vsub.f32 %v3209_v10, %v4390_v24  ;;  %v3379_v10 = vld [vmem:[#allocation8 + $0x178] sm:$0xff]  ;;  %v3381_v24 = vpack.c.bf16 %v248_v35, %v244_v56  ;;  %v4393_v3 = vand.u32 4294901760, %v3306_v16  ;;  %v3393_v43 = vpack.c.bf16 %v250_v18, %v246_v23 }
  0xf8   :  { %v3395_v19 = vsub.f32 %v182_v57, %v246_v23  ;;  %v3397_v26 = vsub.f32 %v185_v41, %v250_v18  ;;  %v4248_v48 = vand.u32 4294901760, %v3023_v13  ;;  %v4249_v47 = vand.u32 4294901760, %v3025_v14 }
  0xf9   :  { %4391 = vst [vmem:[#allocation45_spill] sm:$0xff] %v3381_v24  ;;  %v3391_v40 = vpack.c.bf16 %v4393_v3, %v4392_v59  ;;  %4395 = vst [vmem:[#allocation47_spill] sm:$0xff] %v3393_v43  ;;  %2370 = vmatprep.subr.bf16.mxu0 %v3381_v24  ;;  %v4250_v44 = vand.u32 4294901760, %v3379_v10  ;;  %v4254_v23 = vand.u32 4294901760, %v3027_v15  ;;  %v4255_v18 = vand.u32 4294901760, %v3031_v17 }
  0xfa   :  { %2372 = vmatpush1.bf16.msra.mxu0 %v3393_v43  ;;  %v4263_v37 = vand.u32 4294901760, %v3236_v52  ;;  %v4246_v56 = vmov 0.0   ;;  %v332_v35 = vsub.f32 %v3023_v13, %v4248_v48  ;;  %v344_v57 = vsub.f32 %v3025_v14, %v4249_v47 }
  0xfb   :  { %4394 = vst [vmem:[#allocation46_spill] sm:$0xff] %v3391_v40  ;;  %2558 = vmatprep.subr.bf16.mxu1 %v3391_v40  ;;  %284 = vmatprep.mubr.f32.mxu0 %v4246_v56  ;;  %v3422_v41 = vpack.c.bf16 %v4250_v44, %v4251_v27  ;;  %v4397_v59 = vand.u32 4294901760, %v3055_v36  ;;  %v338_v56 = vsub.f32 %v3027_v15, %v4254_v23 }
  0xfc   :  { %2560 = vmatpush3.bf16.msra.mxu1 %v3391_v40  ;;  %v350_v48 = vsub.f32 %v3031_v17, %v4255_v18  ;;  %v356_v47 = vsub.f32 %v3231_v53, %v4258_v45  ;;  %v368_v44 = vsub.f32 %v3236_v52, %v4263_v37  ;;  %v333_v27 = vand.u32 4294901760, %v332_v35 }
  0xfd   :  { %4396 = vst [vmem:[#allocation48_spill] sm:$0xff] %v3422_v41  ;;  %v3427_v3 = vsub.f32 %v3055_v36, %v4397_v59  ;;  %v345_v43 = vand.u32 4294901760, %v344_v57  ;;  %2562 = vmatprep.subr.bf16.mxu1 %v3422_v41  ;;  %v4399_v59 = vand.u32 4294901760, %v3059_v39  ;;  %v339_v18 = vand.u32 4294901760, %v338_v56 }
  0xfe   :  { %v351_v40 = vand.u32 4294901760, %v350_v48  ;;  %v357_v45 = vand.u32 4294901760, %v356_v47  ;;  %v369_v24 = vand.u32 4294901760, %v368_v44  ;;  %v4269_v37 = vand.u32 4294901760, %v3241_v31 }
  0xff   :  { %4398 = vst [vmem:[#allocation49_spill] sm:$0xff] %v3427_v3  ;;  %v4272_v36 = vand.u32 4294901760, %v3427_v3  ;;  %v3446_v23 = vsub.f32 %v3059_v39, %v4399_v59  ;;  %v2373_v62 = vpack.c.bf16 %v345_v43, %v333_v27  ;;  %v4268_v39 = vand.u32 4294901760, %v3246_v6 }
 0x100   :  { %2564 = vmatpush3.bf16.msra.mxu1 %v3422_v41  ;;  %v3454_v52 = vpack.c.bf16 %v351_v40, %v339_v18  ;;  %v3456_v53 = vpack.c.bf16 %v369_v24, %v357_v45  ;;  %v4271_v48 = vand.u32 4294901760, %v3278_v20  ;;  %v362_v27 = vsub.f32 %v3241_v31, %v4269_v37 }
 0x101   :  { %4400 = vst [vmem:[#allocation50_spill] sm:$0xff] %v3446_v23  ;;  %v1315_v35 = vsub.f32 %v3427_v3, %v4272_v36  ;;  %v4270_v57 = vand.u32 4294901760, %v3446_v23  ;;  %2374 = vmatprep.subr.bf16.mxu0 %v2373_v62  ;;  %v4278_v44 = vand.u32 4294901760, %v3283_v34  ;;  %v374_v24 = vsub.f32 %v3246_v6, %v4268_v39 }
 0x102   :  { %4401 = vst [vmem:[#allocation51_spill] sm:$0xff] %v3456_v53  ;;  %v380_v40 = vsub.f32 %v3278_v20, %v4271_v48  ;;  %v4402_v62 = vand.u32 4294901760, %v3092_v51  ;;  %v4404_v45 = vand.u32 4294901760, %v3098_v54  ;;  %v4275_v37 = vand.u32 4294901760, %v3288_v61 }
 0x103   :  { %v1316_v47 = vand.u32 4294901760, %v1315_v35  ;;  %v1322_v43 = vsub.f32 %v3446_v23, %v4270_v57  ;;  %v363_v35 = vand.u32 4294901760, %v362_v27  ;;  %v392_v39 = vsub.f32 %v3283_v34, %v4278_v44 }
 0x104   :  { %v3476_v18 = vsub.f32 %v3092_v51, %v4402_v62  ;;  %v3481_v56 = vsub.f32 %v3098_v54, %v4404_v45  ;;  %v375_v57 = vand.u32 4294901760, %v374_v24  ;;  %v381_v48 = vand.u32 4294901760, %v380_v40 }
 0x105   :  { %v1323_v59 = vand.u32 4294901760, %v1322_v43  ;;  %v393_v41 = vand.u32 4294901760, %v392_v39  ;;  %v386_v54 = vsub.f32 %v3288_v61, %v4275_v37  ;;  %v4279_v43 = vand.u32 4294901760, %v3293_v38 }
 0x106   :  { %4403 = vst [vmem:[#allocation52_spill] sm:$0xff] %v3476_v18  ;;  %4405 = vst [vmem:[#allocation53_spill] sm:$0xff] %v3481_v56  ;;  %v4276_v36 = vand.u32 4294901760, %v3476_v18  ;;  %v4277_v51 = vand.u32 4294901760, %v3481_v56  ;;  %v3495_v27 = vpack.c.bf16 %v375_v57, %v363_v35 }
 0x107   :  { %v3489_v62 = vpack.c.bf16 %v1323_v59, %v1316_v47  ;;  %v4280_v47 = vand.u32 4294901760, %v3313_v22  ;;  %v3505_v39 = vpack.c.bf16 %v393_v41, %v381_v48  ;;  %v387_v45 = vand.u32 4294901760, %v386_v54 }
 0x108   :  { %4407 = vst [vmem:[#allocation55_spill] sm:$0xff] %v3495_v27  ;;  %v1329_v24 = vsub.f32 %v3476_v18, %v4276_v36  ;;  %v1336_v40 = vsub.f32 %v3481_v56, %v4277_v51  ;;  %v398_v57 = vsub.f32 %v3293_v38, %v4279_v43  ;;  %v4282_v59 = vand.u32 4294901760, %v3318_v50 }
 0x109   :  { %4406 = vst [vmem:[#allocation54_spill] sm:$0xff] %v3489_v62  ;;  %2566 = vmatprep.subr.bf16.mxu1 %v3489_v62  ;;  %4408 = vst [vmem:[#allocation56_spill] sm:$0xff] %v3505_v39  ;;  %v404_v36 = vsub.f32 %v3313_v22, %v4280_v47  ;;  %v4409_v51 = vand.u32 4294901760, %v3131_v2  ;;  %v4411_v54 = vand.u32 4294901760, %v3136_v5 }
 0x10a   :  { %v1330_v35 = vand.u32 4294901760, %v1329_v24  ;;  %v1337_v37 = vand.u32 4294901760, %v1336_v40  ;;  %v399_v41 = vand.u32 4294901760, %v398_v57  ;;  %v416_v48 = vsub.f32 %v3318_v50, %v4282_v59 }
 0x10b   :  { %v3517_v44 = vsub.f32 %v3131_v2, %v4409_v51  ;;  %v3525_v43 = vsub.f32 %v3136_v5, %v4411_v54  ;;  %v4283_v24 = vand.u32 4294901760, %v3323_v42  ;;  %v405_v47 = vand.u32 4294901760, %v404_v36 }
 0x10c   :  { %v3528_v40 = vpack.c.bf16 %v1337_v37, %v1330_v35  ;;  %v4285_v2 = vand.u32 4294901760, %v3328_v30  ;;  %v3532_v51 = vpack.c.bf16 %v399_v41, %v387_v45  ;;  %v417_v57 = vand.u32 4294901760, %v416_v48 }
 0x10d   :  { %4410 = vst [vmem:[#allocation57_spill] sm:$0xff] %v3517_v44  ;;  %4412 = vst [vmem:[#allocation58_spill] sm:$0xff] %v3525_v43  ;;  %v4284_v39 = vand.u32 4294901760, %v3517_v44  ;;  %v4286_v62 = vand.u32 4294901760, %v3525_v43  ;;  %v410_v59 = vsub.f32 %v3323_v42, %v4283_v24  ;;  %v4287_v36 = vand.u32 4294901760, %v3334_v0 }
 0x10e   :  { %4413 = vst [vmem:[#allocation59_spill] sm:$0xff] %v3528_v40  ;;  %4414 = vst [vmem:[#allocation60_spill] sm:$0xff] %v3532_v51  ;;  %v422_v37 = vsub.f32 %v3328_v30, %v4285_v2  ;;  %v4289_v45 = vand.u32 4294901760, %v3339_v49  ;;  %v3546_v35 = vpack.c.bf16 %v417_v57, %v405_v47  ;;  %v4416_v54 = vand.u32 4294901760, %v3171_v25 }
 0x10f   :  { %v1343_v5 = vsub.f32 %v3517_v44, %v4284_v39  ;;  %v1350_v41 = vsub.f32 %v3525_v43, %v4286_v62  ;;  %v411_v48 = vand.u32 4294901760, %v410_v59  ;;  %v428_v2 = vsub.f32 %v3334_v0, %v4287_v36 }
 0x110   :  { %4415 = vst [vmem:[#allocation61_spill] sm:$0xff] %v3546_v35  ;;  %v3554_v24 = vsub.f32 %v3171_v25, %v4416_v54  ;;  %v423_v51 = vand.u32 4294901760, %v422_v37  ;;  %v440_v47 = vsub.f32 %v3339_v49, %v4289_v45  ;;  %v4418_v59 = vand.u32 4294901760, %v3176_v28 }
 0x111   :  { %v1344_v39 = vand.u32 4294901760, %v1343_v5  ;;  %v1351_v57 = vand.u32 4294901760, %v1350_v41  ;;  %v4291_v25 = vand.u32 4294901760, %v3344_v7  ;;  %v429_v37 = vand.u32 4294901760, %v428_v2 }
 0x112   :  { %4417 = vst [vmem:[#allocation62_spill] sm:$0xff] %v3554_v24  ;;  %v4290_v35 = vand.u32 4294901760, %v3554_v24  ;;  %v3566_v62 = vsub.f32 %v3176_v28, %v4418_v59  ;;  %v3569_v5 = vpack.c.bf16 %v423_v51, %v411_v48  ;;  %v441_v54 = vand.u32 4294901760, %v440_v47 }
 0x113   :  { %v4292_v36 = vand.u32 4294901760, %v3349_v8  ;;  %v3572_v40 = vpack.c.bf16 %v1351_v57, %v1344_v39  ;;  %v434_v28 = vsub.f32 %v3344_v7, %v4291_v25  ;;  %v4294_v51 = vand.u32 4294901760, %v3355_v29 }
 0x114   :  { %4419 = vst [vmem:[#allocation63_spill] sm:$0xff] %v3566_v62  ;;  %4420 = vst [vmem:[#allocation64_spill] sm:$0xff] %v3569_v5  ;;  %v1357_v41 = vsub.f32 %v3554_v24, %v4290_v35  ;;  %v4293_v45 = vand.u32 4294901760, %v3566_v62  ;;  %v3581_v59 = vpack.c.bf16 %v441_v54, %v429_v37  ;;  %v4297_v39 = vand.u32 4294901760, %v3360_v1 }
 0x115   :  { %4421 = vst [vmem:[#allocation65_spill] sm:$0xff] %v3572_v40  ;;  %v446_v2 = vsub.f32 %v3349_v8, %v4292_v36  ;;  %v435_v57 = vand.u32 4294901760, %v434_v28  ;;  %v4423_v35 = vand.u32 4294901760, %v3211_v4  ;;  %v452_v54 = vsub.f32 %v3355_v29, %v4294_v51 }
 0x116   :  { %4422 = vst [vmem:[#allocation66_spill] sm:$0xff] %v3581_v59  ;;  %v1358_v48 = vand.u32 4294901760, %v1357_v41  ;;  %v1364_v47 = vsub.f32 %v3566_v62, %v4293_v45  ;;  %v464_v36 = vsub.f32 %v3360_v1, %v4297_v39  ;;  %v4425_v41 = vand.u32 4294901760, %v3216_v9  ;;  %v4430_v39 = vld [vmem:[#allocation40_spill] sm:$0xff] }
 0x117   :  { %v3594_v25 = vsub.f32 %v3211_v4, %v4423_v35  ;;  %v447_v37 = vand.u32 4294901760, %v446_v2  ;;  %v4298_v4 = vand.u32 4294901760, %v3363_v32  ;;  %v4300_v35 = vand.u32 4294901760, %v3366_v55 }
 0x118   :  { %v3605_v59 = vsub.f32 %v3216_v9, %v4425_v41  ;;  %v1365_v28 = vand.u32 4294901760, %v1364_v47  ;;  %v453_v5 = vand.u32 4294901760, %v452_v54  ;;  %v465_v51 = vand.u32 4294901760, %v464_v36 }
 0x119   :  { %4424 = vst [vmem:[#allocation67_spill] sm:$0xff] %v3594_v25  ;;  %v4296_v45 = vand.u32 4294901760, %v3594_v25  ;;  %v3610_v2 = vpack.c.bf16 %v447_v37, %v435_v57  ;;  %v458_v47 = vsub.f32 %v3363_v32, %v4298_v4  ;;  %v470_v41 = vsub.f32 %v3366_v55, %v4300_v35  ;;  %v4433_v35 = vld [vmem:[#allocation41_spill] sm:$0xff] }
 0x11a   :  { %4426 = vst [vmem:[#allocation68_spill] sm:$0xff] %v3605_v59  ;;  %v4301_v40 = vand.u32 4294901760, %v3605_v59  ;;  %v3613_v27 = vpack.c.bf16 %v1365_v28, %v1358_v48  ;;  %v3624_v57 = vpack.c.bf16 %v465_v51, %v453_v5  ;;  %v4302_v48 = vand.u32 4294901760, %v3369_v33 }
 0x11b   :  { %4427 = vst [vmem:[#allocation69_spill] sm:$0xff] %v3610_v2  ;;  %v1371_v9 = vsub.f32 %v3594_v25, %v4296_v45  ;;  %v4303_v37 = vand.u32 4294901760, %v3371_v12  ;;  %v459_v28 = vand.u32 4294901760, %v458_v47  ;;  %v471_v45 = vand.u32 4294901760, %v470_v41 }
 0x11c   :  { %4428 = vst [vmem:[#allocation70_spill] sm:$0xff] %v3613_v27  ;;  %4429 = vst [vmem:[#allocation71_spill] sm:$0xff] %v3624_v57  ;;  %v1378_v36 = vsub.f32 %v3605_v59, %v4301_v40  ;;  %v4431_v2 = vand.u32 4294901760, %v4430_v39  ;;  %v476_v5 = vsub.f32 %v3369_v33, %v4302_v48  ;;  %v4434_v40 = vand.u32 4294901760, %v4433_v35 }
 0x11d   :  { %v1372_v54 = vand.u32 4294901760, %v1371_v9  ;;  %v488_v51 = vsub.f32 %v3371_v12, %v4303_v37  ;;  %v3647_v47 = vpack.c.bf16 %v471_v45, %v459_v28  ;;  %v4309_v28 = vand.u32 4294901760, %v3385_v58 }
 0x11e   :  { %v3634_v4 = vsub.f32 %v4430_v39, %v4431_v2  ;;  %v1379_v27 = vand.u32 4294901760, %v1378_v36  ;;  %v3645_v9 = vsub.f32 %v4433_v35, %v4434_v40  ;;  %v4304_v39 = vand.u32 4294901760, %v3373_v63 }
 0x11f   :  { %4436 = vst [vmem:[#allocation72_spill] sm:$0xff] %v3647_v47  ;;  %v4306_v2 = vand.u32 4294901760, %v3375_v11  ;;  %v477_v48 = vand.u32 4294901760, %v476_v5  ;;  %v489_v57 = vand.u32 4294901760, %v488_v51  ;;  %v4310_v35 = vand.u32 4294901760, %v3383_v60 }
 0x120   :  { %4432 = vst [vmem:[#allocation40_spill] sm:$0xff] %v3634_v4  ;;  %4435 = vst [vmem:[#allocation41_spill] sm:$0xff] %v3645_v9  ;;  %v4305_v41 = vand.u32 4294901760, %v3634_v4  ;;  %v3652_v36 = vpack.c.bf16 %v1379_v27, %v1372_v54  ;;  %v4307_v53 = vand.u32 4294901760, %v3645_v9  ;;  %v482_v40 = vsub.f32 %v3373_v63, %v4304_v39 }
 0x121   :  { %v494_v45 = vsub.f32 %v3375_v11, %v4306_v2  ;;  %v3665_v27 = vpack.c.bf16 %v489_v57, %v477_v48  ;;  %v4439_v5 = vand.u32 4294901760, %v3295_v46  ;;  %v500_v2 = vsub.f32 %v3383_v60, %v4310_v35 }
 0x122   :  { %4437 = vst [vmem:[#allocation73_spill] sm:$0xff] %v3652_v36  ;;  %v1385_v37 = vsub.f32 %v3634_v4, %v4305_v41  ;;  %v1392_v54 = vsub.f32 %v3645_v9, %v4307_v53  ;;  %v483_v41 = vand.u32 4294901760, %v482_v40  ;;  %v512_v48 = vsub.f32 %v3385_v58, %v4309_v28 }
 0x123   :  { %4438 = vst [vmem:[#allocation74_spill] sm:$0xff] %v3665_v27  ;;  %v3674_v51 = vsub.f32 %v3295_v46, %v4439_v5  ;;  %v495_v47 = vand.u32 4294901760, %v494_v45  ;;  %v4441_v27 = vand.u32 4294901760, %v3306_v16  ;;  %v4311_v40 = vand.u32 4294901760, %v3395_v19 }
 0x124   :  { %v1386_v39 = vand.u32 4294901760, %v1385_v37  ;;  %v1393_v57 = vand.u32 4294901760, %v1392_v54  ;;  %v501_v37 = vand.u32 4294901760, %v500_v2  ;;  %v4313_v45 = vand.u32 4294901760, %v3397_v26 }
 0x125   :  { %4440 = vst [vmem:[#allocation75_spill] sm:$0xff] %v3674_v51  ;;  %v4312_v53 = vand.u32 4294901760, %v3674_v51  ;;  %v3686_v36 = vsub.f32 %v3306_v16, %v4441_v27  ;;  %v3688_v46 = vpack.c.bf16 %v495_v47, %v483_v41  ;;  %v513_v54 = vand.u32 4294901760, %v512_v48 }
 0x126   :  { %v3692_v5 = vpack.c.bf16 %v1393_v57, %v1386_v39  ;;  %v506_v16 = vsub.f32 %v3395_v19, %v4311_v40  ;;  %v518_v47 = vsub.f32 %v3397_v26, %v4313_v45  ;;  %v4444_v39 = vand.u32 4294901760, %v3377_v21 }
 0x127   :  { %4442 = vst [vmem:[#allocation76_spill] sm:$0xff] %v3686_v36  ;;  %4443 = vst [vmem:[#allocation77_spill] sm:$0xff] %v3688_v46  ;;  %v1399_v28 = vsub.f32 %v3674_v51, %v4312_v53  ;;  %v4316_v35 = vand.u32 4294901760, %v3686_v36  ;;  %v3711_v27 = vpack.c.bf16 %v513_v54, %v501_v37  ;;  %v4446_v40 = vand.u32 4294901760, %v3379_v10  ;;  %v4449_v54 = vld [vmem:[#allocation36_spill] sm:$0xff] }
 0x128   :  { %v3709_v2 = vsub.f32 %v3377_v21, %v4444_v39  ;;  %v507_v45 = vand.u32 4294901760, %v506_v16  ;;  %v519_v46 = vand.u32 4294901760, %v518_v47  ;;  %v3755_v16 = vpack.c.bf16 %v3525_v43, %v3517_v44  ;;  %v1991_v44 = vld [vmem:[#allocation5] ss:$0 sm:$0xff] }
 0x129   :  { %v1400_v57 = vand.u32 4294901760, %v1399_v28  ;;  %v1406_v48 = vsub.f32 %v3686_v36, %v4316_v35  ;;  %v3719_v53 = vsub.f32 %v3379_v10, %v4446_v40  ;;  %v4448_v28 = vld [vmem:[#allocation35_spill] sm:$0xff]  ;;  %v3729_v35 = vpack.c.bf16 %v3446_v23, %v3427_v3  ;;  %v4452_v23 = vld [vmem:[#allocation21_spill] sm:$0xff] }
 0x12a   :  { %4445 = vst [vmem:[#allocation78_spill] sm:$0xff] %v3709_v2  ;;  %v4319_v41 = vand.u32 4294901760, %v3709_v2  ;;  %v3731_v14 = vpack.c.bf16 %v519_v46, %v507_v45  ;;  %v3747_v46 = vpack.c.bf16 %v3481_v56, %v3476_v18  ;;  %v3763_v13 = vpack.c.bf16 %v3566_v62, %v3554_v24  ;;  %v1992_v56 = vld [vmem:[#allocation7] ss:$0 sm:$0xff] }
 0x12b   :  { %4447 = vst [vmem:[#allocation79_spill] sm:$0xff] %v3719_v53  ;;  %v1407_v39 = vand.u32 4294901760, %v1406_v48  ;;  %v4320_v37 = vand.u32 4294901760, %v3719_v53  ;;  %v3771_v45 = vpack.c.bf16 %v3605_v59, %v3594_v25 }
 0x12c   :  { %v1413_v10 = vsub.f32 %v3709_v2, %v4319_v41 }
 0x12d   :  { %v3740_v47 = vpack.c.bf16 %v1407_v39, %v1400_v57  ;;  %v1420_v48 = vsub.f32 %v3719_v53, %v4320_v37  ;;  %v3781_v57 = vpack.c.bf16 %v3645_v9, %v3634_v4  ;;  %v3795_v37 = vpack.c.bf16 %v3719_v53, %v3709_v2  ;;  %v4451_v53 = vld [vmem:[#allocation19_spill] sm:$0xff] }
 0x12e   :  { %v1414_v41 = vand.u32 4294901760, %v1413_v10 }
 0x12f   :  { %v1421_v39 = vand.u32 4294901760, %v1420_v48  ;;  %4450 = vst [vmem:[#allocation35_spill] sm:$0xff] %v3795_v37 }
 0x131   :  { %v3773_v21 = vpack.c.bf16 %v1421_v39, %v1414_v41  ;;  %v3789_v41 = vpack.c.bf16 %v3686_v36, %v3674_v51 }
 0x16e   :  { %v95_v48 = vpop.xlane.xlu0 %94 }
 0x16f   :  { %v102_v9 = vmul.f32 0.0078125, %v95_v48 }
 0x171   :  { %v106_v4 = vadd.f32 1e-05, %v102_v9 }
 0x172   :  { %v97_v59 = vpop.xlane.xlu1 %96  ;;  %v99_v25 = vpop.xlane.xlu0 %98 }
 0x173   :  { %2795 = vrsqrt.f32 %v106_v4  ;;  %v103_v10 = vmul.f32 0.0078125, %v97_v59  ;;  %v104_v62 = vmul.f32 0.0078125, %v99_v25  ;;  %v4453_v25 = vld [vmem:[#allocation20_spill] sm:$0xff] }
 0x175   :  { %v107_v40 = vadd.f32 1e-05, %v103_v10  ;;  %v108_v24 = vadd.f32 1e-05, %v104_v62 }
 0x176   :  { %v101_v43 = vpop.xlane.xlu1 %100 }
 0x177   :  { %2797 = vrsqrt.f32 %v107_v40  ;;  %v105_v36 = vmul.f32 0.0078125, %v101_v43 }
 0x178   :  { %2799 = vrsqrt.f32 %v108_v24 }
 0x179   :  { %v109_v51 = vadd.f32 1e-05, %v105_v36  ;;  %v4454_v36 = vld [vmem:[#allocation22_spill] sm:$0xff] }
 0x17b   :  { %2801 = vrsqrt.f32 %v109_v51 }
 0x17d   :  { %v2796_v39 = vpop.eup %2795 }
 0x17e   :  { %v114_v2 = vmul.f32 %v2796_v39, %v4451_v53 }
 0x180   :  { %v125_v48 = vmul.f32 %v1991_v44, %v114_v2 }
 0x181   :  { %v2798_v9 = vpop.eup %2797 }
 0x182   :  { %v2800_v18 = vpop.eup %2799  ;;  %v115_v4 = vmul.f32 %v2798_v9, %v4452_v23  ;;  %v136_v59 = vadd.f32 %v1992_v56, %v125_v48 }
 0x183   :  { %v116_v10 = vmul.f32 %v2800_v18, %v4453_v25 }
 0x184   :  { %v126_v62 = vmul.f32 %v1991_v44, %v115_v4  ;;  %v3800_v3 = vand.u32 4294901760, %v136_v59 }
 0x185   :  { %v2802_v43 = vpop.eup %2801  ;;  %v127_v24 = vmul.f32 %v1991_v44, %v116_v10 }
 0x186   :  { %v117_v51 = vmul.f32 %v2802_v43, %v4454_v36  ;;  %v3804_v40 = vsub.f32 %v136_v59, %v3800_v3  ;;  %v137_v53 = vadd.f32 %v1992_v56, %v126_v62 }
 0x187   :  { %v138_v39 = vadd.f32 %v1992_v56, %v127_v24 }
 0x188   :  { %v128_v2 = vmul.f32 %v1991_v44, %v117_v51  ;;  %v3807_v37 = vand.u32 4294901760, %v3804_v40  ;;  %v3809_v23 = vand.u32 4294901760, %v137_v53  ;;  %v4457_v51 = vld [vmem:[#allocation51_spill] sm:$0xff] }
 0x189   :  { %v3811_v48 = vand.u32 4294901760, %v138_v39 }
 0x18a   :  { %v288_v18 = vsub.f32 %v3804_v40, %v3807_v37  ;;  %v3816_v9 = vsub.f32 %v137_v53, %v3809_v23  ;;  %v139_v4 = vadd.f32 %v1992_v56, %v128_v2  ;;  %v4456_v56 = vmov 0.0  }
 0x18b   :  { %v3819_v59 = vsub.f32 %v138_v39, %v3811_v48 }
 0x18c   :  { %v289_v25 = vand.u32 4294901760, %v288_v18  ;;  %v3822_v44 = vand.u32 4294901760, %v3816_v9  ;;  %v3824_v10 = vand.u32 4294901760, %v139_v4 }
 0x18d   :  { %v3827_v62 = vand.u32 4294901760, %v3819_v59 }
 0x18e   :  { %290 = vmatmul.mubr.f32.vlgmr.msra.gmra.mrb[0].mxu0 %v289_v25  ;;  %2145 = vmatprep.mubr.f32.mxu1 %v289_v25  ;;  %v299_v43 = vsub.f32 %v3816_v9, %v3822_v44  ;;  %v3832_v24 = vsub.f32 %v139_v4, %v3824_v10  ;;  %v4458_v4 = vld [vmem:[#allocation55_spill] sm:$0xff] }
 0x18f   :  { %4455 = vst [vmem:[#allocation36_spill] sm:$0xff] %v3827_v62  ;;  %2376 = vmatpush1.bf16.msra.mxu0 %v3454_v52  ;;  %295 = vmatprep.mubr.f32.mxu0 %v4456_v56  ;;  %v310_v36 = vsub.f32 %v3819_v59, %v3827_v62  ;;  %v4459_v52 = vld [vmem:[#allocation54_spill] sm:$0xff]  ;;  %v4460_v62 = vld [vmem:[#allocation56_spill] sm:$0xff] }
 0x190   :  { %2378 = vmatprep.subr.bf16.mxu0 %v4457_v51  ;;  %v300_v53 = vand.u32 4294901760, %v299_v43  ;;  %v3840_v39 = vand.u32 4294901760, %v3832_v24  ;;  %v4461_v43 = vld [vmem:[#allocation59_spill] sm:$0xff]  ;;  %v4463_v51 = vld [vmem:[#allocation61_spill] sm:$0xff] }
 0x191   :  { %v311_v2 = vand.u32 4294901760, %v310_v36  ;;  %v4462_v36 = vld [vmem:[#allocation60_spill] sm:$0xff] }
 0x192   :  { %301 = vmatmul.mubr.f32.gmra.mrb[2].mxu0 %v300_v53  ;;  %2146 = vmatmul.mubr.f32.vlgmr.msra.gmra.mrb[0].mxu1 %v300_v53  ;;  %v321_v18 = vsub.f32 %v3832_v24, %v3840_v39  ;;  %v4464_v53 = vld [vmem:[#allocation65_spill] sm:$0xff] }
 0x193   :  { %2380 = vmatpush1.bf16.msra.mxu0 %v4458_v4  ;;  %2568 = vmatpush3.bf16.msra.mxu1 %v4459_v52  ;;  %v4468_v4 = vld [vmem:[#allocation69_spill] sm:$0xff]  ;;  %v4469_v52 = vld [vmem:[#allocation71_spill] sm:$0xff] }
 0x194   :  { %2148 = vmatprep.mubr.f32.mxu1 %v311_v2  ;;  %306 = vmatprep.mubr.f32.mxu0 %v4456_v56  ;;  %v322_v25 = vand.u32 4294901760, %v321_v18  ;;  %v4465_v18 = vld [vmem:[#allocation64_spill] sm:$0xff] }
 0x195   :  { %2382 = vmatprep.subr.bf16.mxu0 %v4460_v62  ;;  %2570 = vmatprep.subr.bf16.mxu1 %v4461_v43  ;;  %v4466_v62 = vld [vmem:[#allocation66_spill] sm:$0xff] }
 0x196   :  { %312 = vmatmul.mubr.f32.gmra.mrb[4].mxu0 %v311_v2  ;;  %2149 = vmatmul.mubr.f32.gmra.mrb[2].mxu1 %v322_v25  ;;  %v4467_v2 = vld [vmem:[#allocation70_spill] sm:$0xff] }
 0x197   :  { %2384 = vmatpush1.bf16.msra.mxu0 %v4462_v36  ;;  %2572 = vmatpush3.bf16.msra.mxu1 %v4461_v43  ;;  %v4470_v43 = vld [vmem:[#allocation73_spill] sm:$0xff]  ;;  %v4471_v36 = vld [vmem:[#allocation72_spill] sm:$0xff] }
 0x198   :  { %2183 = vmatprep.mubr.f32.mxu1 %v3800_v3  ;;  %317 = vmatprep.mubr.f32.mxu0 %v4456_v56 }
 0x199   :  { %2386 = vmatprep.subr.bf16.mxu0 %v4463_v51  ;;  %2574 = vmatprep.subr.bf16.mxu1 %v4464_v53  ;;  %v4473_v51 = vld [vmem:[#allocation77_spill] sm:$0xff] }
 0x19a   :  { %323 = vmatmul.mubr.f32.gmra.mrb[6].mxu0 %v322_v25  ;;  %v4472_v25 = vld [vmem:[#allocation74_spill] sm:$0xff] }
 0x19b   :  { %2388 = vmatpush1.bf16.msra.mxu0 %v4465_v18  ;;  %2576 = vmatpush3.bf16.msra.mxu1 %v4464_v53  ;;  %v4474_v53 = vld [vmem:[#allocation17_spill] sm:$0xff]  ;;  %v4475_v18 = vld [vmem:[#allocation16_spill] sm:$0xff] }
 0x19c   :  { %2390 = vmatprep.subr.bf16.mxu0 %v4466_v62  ;;  %2578 = vmatprep.subr.bf16.mxu1 %v4467_v2  ;;  %v4476_v62 = vpack.c.bf16 %v4474_v53, %v4475_v18 }
 0x19d   :  { %553 = vmatprep.mubr.f32.mxu0 %v4456_v56 }
 0x19f   :  { %2392 = vmatpush1.bf16.msra.mxu0 %v4468_v4  ;;  %2580 = vmatpush3.bf16.msra.mxu1 %v4467_v2  ;;  %v4477_v2 = vpack.c.bf16 %v3031_v17, %v3027_v15  ;;  %v4485_v4 = vpack.c.bf16 %v3349_v8, %v3344_v7 }
 0x1a0   :  { %2394 = vmatprep.subr.bf16.mxu0 %v4469_v52  ;;  %2582 = vmatprep.subr.bf16.mxu1 %v4470_v43  ;;  %v4486_v52 = vpack.c.bf16 %v3360_v1, %v3355_v29 }
 0x1a3   :  { %2396 = vmatpush1.bf16.msra.mxu0 %v4471_v36  ;;  %2584 = vmatpush3.bf16.msra.mxu1 %v4470_v43  ;;  %v4488_v43 = vpack.c.bf16 %v3371_v12, %v3369_v33  ;;  %v4490_v36 = vpack.c.bf16 %v3385_v58, %v3383_v60 }
 0x1a4   :  { %2398 = vmatprep.subr.bf16.mxu0 %v4472_v25  ;;  %2586 = vmatprep.subr.bf16.mxu1 %v3692_v5  ;;  %v4492_v25 = vld [vmem:[#allocation15_spill] sm:$0xff] }
 0x1a7   :  { %2400 = vmatpush1.bf16.msra.mxu0 %v4473_v51  ;;  %2588 = vmatpush3.bf16.msra.mxu1 %v3692_v5  ;;  %v4479_v5 = vpack.c.bf16 %v3246_v6, %v3241_v31  ;;  %v4493_v51 = vld [vmem:[#allocation35_spill] sm:$0xff] }
 0x1a8   :  { %2402 = vmatprep.subr.bf16.mxu0 %v3711_v27  ;;  %2590 = vmatprep.subr.bf16.mxu1 %v3740_v47  ;;  %v4480_v27 = vpack.c.bf16 %v3283_v34, %v3278_v20 }
 0x1ab   :  { %2404 = vmatpush1.bf16.msra.mxu0 %v3731_v14  ;;  %2592 = vmatpush3.bf16.msra.mxu1 %v3740_v47  ;;  %v4478_v14 = vpack.c.bf16 %v4449_v54, %v4448_v28  ;;  %v4483_v47 = vpack.c.bf16 %v3328_v30, %v3323_v42 }
 0x1ac   :  { %2406 = vmatprep.subr.bf16.mxu0 %v4476_v62  ;;  %2594 = vmatprep.subr.bf16.mxu1 %v3773_v21  ;;  %v4494_v62 = vld [vmem:[#allocation18_spill] sm:$0xff] }
 0x1ae   :  { %555 = vmatmul.mubr.f32.vlgmr.msra.gmra.mrb[0].mxu0 %v3800_v3 }
 0x1af   :  { %2408 = vmatpush1.bf16.msra.mxu0 %v4477_v2  ;;  %2596 = vmatpush3.bf16.msra.mxu1 %v3773_v21  ;;  %v4481_v21 = vpack.c.bf16 %v3293_v38, %v3288_v61  ;;  %v4496_v2 = vld [vmem:[#allocation24_spill] sm:$0xff] }
 0x1b0   :  { %560 = vmatprep.mubr.f32.mxu0 %v4456_v56  ;;  %2410 = vmatprep.subr.bf16.mxu0 %v4478_v14  ;;  %v4499_v14 = vld [vmem:[#allocation27_spill] sm:$0xff] }
 0x1b1   :  { %2598 = vmatprep.subr.bf16.mxu1 %v3729_v35 }
 0x1b2   :  { %562 = vmatmul.mubr.f32.gmra.mrb[2].mxu0 %v3809_v23  ;;  %2184 = vmatmul.mubr.f32.vlgmr.msra.gmra.mrb[0].mxu1 %v3809_v23 }
 0x1b3   :  { %2412 = vmatpush1.bf16.msra.mxu0 %v4479_v5  ;;  %2186 = vmatprep.mubr.f32.mxu1 %v3811_v48  ;;  %v4500_v5 = vld [vmem:[#allocation28_spill] sm:$0xff] }
 0x1b4   :  { %2600 = vmatpush3.bf16.msra.mxu1 %v3729_v35  ;;  %567 = vmatprep.mubr.f32.mxu0 %v4456_v56  ;;  %v4482_v35 = vpack.c.bf16 %v3318_v50, %v3313_v22 }
 0x1b5   :  { %2414 = vmatprep.subr.bf16.mxu0 %v4480_v27  ;;  %2602 = vmatprep.subr.bf16.mxu1 %v3747_v46  ;;  %v4502_v27 = vld [vmem:[#allocation30_spill] sm:$0xff] }
 0x1b6   :  { %569 = vmatmul.mubr.f32.gmra.mrb[4].mxu0 %v3811_v48  ;;  %2187 = vmatmul.mubr.f32.gmra.mrb[2].mxu1 %v3824_v10 }
 0x1b7   :  { %2416 = vmatpush1.bf16.msra.mxu0 %v4481_v21  ;;  %2221 = vmatprep.mubr.f32.mxu1 %v3804_v40  ;;  %v4503_v21 = vld [vmem:[#allocation31_spill] sm:$0xff] }
 0x1b8   :  { %2604 = vmatpush3.bf16.msra.mxu1 %v3747_v46  ;;  %574 = vmatprep.mubr.f32.mxu0 %v4456_v56  ;;  %v4484_v46 = vpack.c.bf16 %v3339_v49, %v3334_v0 }
 0x1b9   :  { %2418 = vmatprep.subr.bf16.mxu0 %v4482_v35  ;;  %2606 = vmatprep.subr.bf16.mxu1 %v3755_v16  ;;  %v4505_v35 = vld [vmem:[#allocation33_spill] sm:$0xff] }
 0x1ba   :  { %576 = vmatmul.mubr.f32.gmra.mrb[6].mxu0 %v3824_v10 }
 0x1bb   :  { %2420 = vmatpush1.bf16.msra.mxu0 %v4483_v47  ;;  %710 = vmatprep.mubr.f32.mxu0 %v4456_v56  ;;  %v4506_v47 = vld [vmem:[#allocation34_spill] sm:$0xff] }
 0x1bc   :  { %2608 = vmatpush3.bf16.msra.mxu1 %v3755_v16  ;;  %2422 = vmatprep.subr.bf16.mxu0 %v4484_v46  ;;  %v4487_v16 = vpack.c.bf16 %v3366_v55, %v3363_v32  ;;  %v4507_v46 = vld [vmem:[#allocation37_spill] sm:$0xff] }
 0x1bd   :  { %2610 = vmatprep.subr.bf16.mxu1 %v3763_v13 }
 0x1bf   :  { %2424 = vmatpush1.bf16.msra.mxu0 %v4485_v4  ;;  %v4508_v4 = vld [vmem:[#allocation38_spill] sm:$0xff] }
 0x1c0   :  { %2612 = vmatpush3.bf16.msra.mxu1 %v3763_v13  ;;  %2426 = vmatprep.subr.bf16.mxu0 %v4486_v52  ;;  %v4489_v13 = vpack.c.bf16 %v3375_v11, %v3373_v63  ;;  %v4510_v52 = vld [vmem:[#allocation42_spill] sm:$0xff] }
 0x1c1   :  { %2614 = vmatprep.subr.bf16.mxu1 %v3771_v45 }
 0x1c3   :  { %2428 = vmatpush1.bf16.msra.mxu0 %v4487_v16  ;;  %v4511_v16 = vld [vmem:[#allocation43_spill] sm:$0xff] }
 0x1c4   :  { %2616 = vmatpush3.bf16.msra.mxu1 %v3771_v45  ;;  %2430 = vmatprep.subr.bf16.mxu0 %v4488_v43  ;;  %v4491_v45 = vpack.c.bf16 %v3397_v26, %v3395_v19  ;;  %v4512_v43 = vld [vmem:[#allocation44_spill] sm:$0xff] }
 0x1c5   :  { %2618 = vmatprep.subr.bf16.mxu1 %v3781_v57 }
 0x1c7   :  { %2432 = vmatpush1.bf16.msra.mxu0 %v4489_v13  ;;  %v4513_v13 = vld [vmem:[#allocation45_spill] sm:$0xff] }
 0x1c8   :  { %2620 = vmatpush3.bf16.msra.mxu1 %v3781_v57  ;;  %2434 = vmatprep.subr.bf16.mxu0 %v4490_v36  ;;  %v4495_v57 = vld [vmem:[#allocation23_spill] sm:$0xff]  ;;  %v4514_v36 = vand.u32 4294901760, %v4475_v18 }
 0x1c9   :  { %2622 = vmatprep.subr.bf16.mxu1 %v3789_v41 }
 0x1cb   :  { %2436 = vmatpush1.bf16.msra.mxu0 %v4491_v45  ;;  %v4515_v45 = vand.u32 4294901760, %v4474_v53  ;;  %v4523_v53 = vld [vmem:[#allocation49_spill] sm:$0xff] }
 0x1cc   :  { %2624 = vmatpush3.bf16.msra.mxu1 %v3789_v41  ;;  %2438 = vmatprep.subr.bf16.mxu0 %v4492_v25  ;;  %v4497_v41 = vld [vmem:[#allocation25_spill] sm:$0xff] }
 0x1cd   :  { %2626 = vmatprep.subr.bf16.mxu1 %v4493_v51 }
 0x1ce   :  { %713 = vmatmul.mubr.f32.vlgmr.msra.gmra.mrb[0].mxu0 %v3804_v40  ;;  %v4498_v40 = vld [vmem:[#allocation26_spill] sm:$0xff] }
 0x1cf   :  { %2440 = vmatpush1.bf16.msra.mxu0 %v4494_v62  ;;  %718 = vmatprep.mubr.f32.mxu0 %v4456_v56 }
 0x1d0   :  { %2628 = vmatpush3.bf16.msra.mxu1 %v4493_v51  ;;  %2442 = vmatprep.subr.bf16.mxu0 %v4495_v57  ;;  %v2469_v51 = vpack.c.bf16 %v4515_v45, %v4514_v36  ;;  %v4524_v36 = vand.u32 4294901760, %v4523_v53  ;;  %v4525_v45 = vld [vmem:[#allocation50_spill] sm:$0xff] }
 0x1d1   :  { %2630 = vmatprep.subr.bf16.mxu1 %v4496_v2 }
 0x1d2   :  { %721 = vmatmul.mubr.f32.gmra.mrb[2].mxu0 %v3816_v9 }
 0x1d3   :  { %2222 = vmatmul.mubr.f32.vlgmr.msra.gmra.mrb[0].mxu1 %v3816_v9  ;;  %2444 = vmatpush1.bf16.msra.mxu0 %v4497_v41  ;;  %v4501_v9 = vld [vmem:[#allocation29_spill] sm:$0xff] }
 0x1d4   :  { %2224 = vmatprep.mubr.f32.mxu1 %v3819_v59  ;;  %2632 = vmatpush3.bf16.msra.mxu1 %v4496_v2 }
 0x1d5   :  { %726 = vmatprep.mubr.f32.mxu0 %v4456_v56  ;;  %2446 = vmatprep.subr.bf16.mxu0 %v4498_v40 }
 0x1d6   :  { %729 = vmatmul.mubr.f32.gmra.mrb[4].mxu0 %v3819_v59  ;;  %2634 = vmatprep.subr.bf16.mxu1 %v4499_v14  ;;  %v4504_v59 = vld [vmem:[#allocation32_spill] sm:$0xff] }
 0x1d7   :  { %2225 = vmatmul.mubr.f32.gmra.mrb[2].mxu1 %v3832_v24  ;;  %2448 = vmatpush1.bf16.msra.mxu0 %v4500_v5 }
 0x1d8   :  { %2636 = vmatpush3.bf16.msra.mxu1 %v4499_v14  ;;  %2259 = vmatprep.mubr.f32.mxu1 %v3807_v37 }
 0x1d9   :  { %734 = vmatprep.mubr.f32.mxu0 %v4456_v56  ;;  %2450 = vmatprep.subr.bf16.mxu0 %v4501_v9 }
 0x1da   :  { %737 = vmatmul.mubr.f32.gmra.mrb[6].mxu0 %v3832_v24  ;;  %2638 = vmatprep.subr.bf16.mxu1 %v4502_v27  ;;  %v4509_v24 = vld [vmem:[#allocation39_spill] sm:$0xff] }
 0x1db   :  { %2452 = vmatpush1.bf16.msra.mxu0 %v4503_v21  ;;  %839 = vmatprep.mubr.f32.mxu0 %v4456_v56 }
 0x1dc   :  { %2640 = vmatpush3.bf16.msra.mxu1 %v4502_v27  ;;  %2454 = vmatprep.subr.bf16.mxu0 %v4504_v59 }
 0x1dd   :  { %2642 = vmatprep.subr.bf16.mxu1 %v4505_v35 }
 0x1df   :  { %2456 = vmatpush1.bf16.msra.mxu0 %v4506_v47 }
 0x1e0   :  { %2644 = vmatpush3.bf16.msra.mxu1 %v4505_v35  ;;  %2458 = vmatprep.subr.bf16.mxu0 %v4507_v46  ;;  %v4516_v46 = vld [vmem:[#allocation46_spill] sm:$0xff]  ;;  %v4526_v35 = vand.u32 4294901760, %v4525_v45 }
 0x1e1   :  { %2646 = vmatprep.subr.bf16.mxu1 %v4508_v4 }
 0x1e3   :  { %2460 = vmatpush1.bf16.msra.mxu0 %v4509_v24  ;;  %v4517_v24 = vld [vmem:[#allocation47_spill] sm:$0xff] }
 0x1e4   :  { %2648 = vmatpush3.bf16.msra.mxu1 %v4508_v4  ;;  %2462 = vmatprep.subr.bf16.mxu0 %v4510_v52  ;;  %v4518_v4 = vand.u32 4294901760, %v3027_v15  ;;  %v4519_v52 = vand.u32 4294901760, %v3031_v17  ;;  %v4527_v15 = vand.u32 4294901760, %v3241_v31  ;;  %v4528_v17 = vand.u32 4294901760, %v3246_v6 }
 0x1e5   :  { %2650 = vmatprep.subr.bf16.mxu1 %v4511_v16  ;;  %v4535_v6 = vand.u32 4294901760, %v3288_v61  ;;  %v4536_v31 = vand.u32 4294901760, %v3293_v38  ;;  %v4542_v61 = vld [vmem:[#allocation58_spill] sm:$0xff] }
 0x1e6   :  { %v2471_v47 = vpack.c.bf16 %v4519_v52, %v4518_v4  ;;  %v4530_v4 = vand.u32 4294901760, %v3283_v34  ;;  %v4539_v34 = vand.u32 4294901760, %v3318_v50  ;;  %v4543_v45 = vand.u32 4294901760, %v4542_v61 }
 0x1e7   :  { %2464 = vmatpush1.bf16.msra.mxu0 %v4512_v43  ;;  %v4520_v43 = vand.u32 4294901760, %v4448_v28  ;;  %v2475_v28 = vpack.c.bf16 %v4528_v17, %v4527_v15  ;;  %v4545_v15 = vand.u32 4294901760, %v3328_v30  ;;  %v4547_v50 = vand.u32 4294901760, %v3339_v49 }
 0x1e8   :  { %2652 = vmatpush3.bf16.msra.mxu1 %v4511_v16  ;;  %2466 = vmatprep.subr.bf16.mxu0 %v4513_v13  ;;  %v4521_v13 = vand.u32 4294901760, %v4449_v54  ;;  %v4522_v16 = vld [vmem:[#allocation48_spill] sm:$0xff]  ;;  %v4529_v54 = vand.u32 4294901760, %v3278_v20  ;;  %v4538_v20 = vand.u32 4294901760, %v3313_v22  ;;  %v4546_v22 = vand.u32 4294901760, %v3334_v0 }
 0x1e9   :  { %2654 = vmatprep.subr.bf16.mxu1 %v4516_v46  ;;  %v4552_v30 = vand.u32 4294901760, %v3344_v7  ;;  %v4554_v49 = vand.u32 4294901760, %v3355_v29  ;;  %v4560_v7 = vand.u32 4294901760, %v3363_v32  ;;  %v4563_v29 = vand.u32 4294901760, %v3371_v12 }
 0x1ea   :  { %v2473_v18 = vpack.c.bf16 %v4521_v13, %v4520_v43  ;;  %v2477_v52 = vpack.c.bf16 %v4530_v4, %v4529_v54  ;;  %v2481_v53 = vpack.c.bf16 %v4539_v34, %v4538_v20  ;;  %v4548_v54 = vld [vmem:[#allocation62_spill] sm:$0xff]  ;;  %v4562_v20 = vand.u32 4294901760, %v3369_v33  ;;  %v4564_v34 = vld [vmem:[#allocation40_spill] sm:$0xff] }
 0x1eb   :  { %2468 = vmatpush1.bf16.msra.mxu0 %v4517_v24  ;;  %v2661_v24 = vpack.c.bf16 %v4526_v35, %v4524_v36  ;;  %v4549_v4 = vand.u32 4294901760, %v4548_v54  ;;  %v4569_v32 = vand.u32 4294901760, %v3375_v11  ;;  %v4571_v33 = vand.u32 4294901760, %v3385_v58  ;;  %v4578_v54 = vld [vmem:[#allocation78_spill] sm:$0xff] }
 0x1ec   :  { %2656 = vmatpush3.bf16.msra.mxu1 %v4516_v46  ;;  %2470 = vmatprep.subr.bf16.mxu0 %v2469_v51  ;;  %v2479_v51 = vpack.c.bf16 %v4536_v31, %v4535_v6 }
 0x1ed   :  { %2658 = vmatprep.subr.bf16.mxu1 %v4522_v16 }
 0x1ee   :  { %843 = vmatmul.mubr.f32.vlgmr.msra.gmra.mrb[0].mxu0 %v3807_v37  ;;  %v4531_v37 = vld [vmem:[#allocation52_spill] sm:$0xff] }
 0x1ef   :  { %2472 = vmatpush1.bf16.msra.mxu0 %v2471_v47  ;;  %848 = vmatprep.mubr.f32.mxu0 %v4456_v56  ;;  %v4532_v35 = vand.u32 4294901760, %v4531_v37  ;;  %v4533_v47 = vld [vmem:[#allocation53_spill] sm:$0xff] }
 0x1f0   :  { %2660 = vmatpush3.bf16.msra.mxu1 %v4522_v16  ;;  %2474 = vmatprep.subr.bf16.mxu0 %v2473_v18  ;;  %v4534_v43 = vand.u32 4294901760, %v4533_v47  ;;  %v4537_v18 = vld [vmem:[#allocation36_spill] sm:$0xff]  ;;  %v4555_v47 = vand.u32 4294901760, %v3360_v1  ;;  %v2493_v1 = vpack.c.bf16 %v4563_v29, %v4562_v20 }
 0x1f1   :  { %2662 = vmatprep.subr.bf16.mxu1 %v2661_v24 }
 0x1f2   :  { %852 = vmatmul.mubr.f32.gmra.mrb[2].mxu0 %v3822_v44  ;;  %v2665_v13 = vpack.c.bf16 %v4534_v43, %v4532_v35  ;;  %v2489_v43 = vpack.c.bf16 %v4555_v47, %v4554_v49 }
 0x1f3   :  { %2260 = vmatmul.mubr.f32.vlgmr.msra.gmra.mrb[0].mxu1 %v3822_v44  ;;  %2476 = vmatpush1.bf16.msra.mxu0 %v2475_v28  ;;  %v4540_v44 = vld [vmem:[#allocation57_spill] sm:$0xff]  ;;  %v2485_v28 = vpack.c.bf16 %v4547_v50, %v4546_v22 }
 0x1f4   :  { %2262 = vmatprep.mubr.f32.mxu1 %v4537_v18  ;;  %2664 = vmatpush3.bf16.msra.mxu1 %v2661_v24  ;;  %v4541_v36 = vand.u32 4294901760, %v4540_v44  ;;  %v4544_v24 = vand.u32 4294901760, %v3323_v42  ;;  %v4553_v42 = vand.u32 4294901760, %v3349_v8  ;;  %v4561_v8 = vand.u32 4294901760, %v3366_v55  ;;  %v4566_v44 = vld [vmem:[#allocation41_spill] sm:$0xff] }
 0x1f5   :  { %857 = vmatprep.mubr.f32.mxu0 %v4456_v56  ;;  %2478 = vmatprep.subr.bf16.mxu0 %v2477_v52  ;;  %v4550_v52 = vld [vmem:[#allocation63_spill] sm:$0xff] }
 0x1f6   :  { %861 = vmatmul.mubr.f32.gmra.mrb[4].mxu0 %v4537_v18  ;;  %2666 = vmatprep.subr.bf16.mxu1 %v2665_v13  ;;  %v2669_v38 = vpack.c.bf16 %v4543_v45, %v4541_v36  ;;  %v2483_v17 = vpack.c.bf16 %v4545_v15, %v4544_v24  ;;  %v4551_v37 = vand.u32 4294901760, %v4550_v52  ;;  %v2487_v0 = vpack.c.bf16 %v4553_v42, %v4552_v30  ;;  %v4572_v24 = vld [vmem:[#allocation75_spill] sm:$0xff] }
 0x1f7   :  { %2263 = vmatmul.mubr.f32.gmra.mrb[2].mxu1 %v3840_v39  ;;  %2480 = vmatpush1.bf16.msra.mxu0 %v2479_v51  ;;  %v2491_v18 = vpack.c.bf16 %v4561_v8, %v4560_v7  ;;  %v4567_v36 = vand.u32 4294901760, %v4566_v44  ;;  %v4568_v45 = vand.u32 4294901760, %v3373_v63  ;;  %v4573_v15 = vand.u32 4294901760, %v4572_v24 }
 0x1f8   :  { %2668 = vmatpush3.bf16.msra.mxu1 %v2665_v13  ;;  %2297 = vmatprep.mubr.f32.mxu1 %v3800_v3  ;;  %v2673_v35 = vpack.c.bf16 %v4551_v37, %v4549_v4  ;;  %v4556_v13 = vld [vmem:[#allocation67_spill] sm:$0xff]  ;;  %v4577_v63 = vand.u32 4294901760, %v3397_v26  ;;  %v4583_v26 = vld [vmem:[#allocation34_spill] sm:$0xff] }
 0x1f9   :  { %866 = vmatprep.mubr.f32.mxu0 %v4456_v56  ;;  %2482 = vmatprep.subr.bf16.mxu0 %v2481_v53  ;;  %v4557_v6 = vand.u32 4294901760, %v4556_v13  ;;  %v4565_v53 = vand.u32 4294901760, %v4564_v34  ;;  %v2495_v55 = vpack.c.bf16 %v4569_v32, %v4568_v45  ;;  %v4580_v4 = vld [vmem:[#allocation79_spill] sm:$0xff] }
 0x1fa   :  { %870 = vmatmul.mubr.f32.gmra.mrb[6].mxu0 %v3840_v39  ;;  %2670 = vmatprep.subr.bf16.mxu1 %v2669_v38  ;;  %v4558_v39 = vld [vmem:[#allocation68_spill] sm:$0xff]  ;;  %v4581_v58 = vand.u32 4294901760, %v4580_v4 }
 0x1fb   :  { %2484 = vmatpush1.bf16.msra.mxu0 %v2483_v17  ;;  %1036 = vmatprep.mubr.f32.mxu0 %v4456_v56  ;;  %v4559_v31 = vand.u32 4294901760, %v4558_v39  ;;  %v2681_v61 = vpack.c.bf16 %v4567_v36, %v4565_v53  ;;  %v4574_v17 = vld [vmem:[#allocation76_spill] sm:$0xff] }
 0x1fc   :  { %2672 = vmatpush3.bf16.msra.mxu1 %v2669_v38  ;;  %2486 = vmatprep.subr.bf16.mxu0 %v2485_v28  ;;  %v4570_v38 = vand.u32 4294901760, %v3383_v60  ;;  %v4575_v22 = vand.u32 4294901760, %v4574_v17  ;;  %v4576_v28 = vand.u32 4294901760, %v3395_v19  ;;  %v4579_v60 = vand.u32 4294901760, %v4578_v54  ;;  %v4582_v19 = vld [vmem:[#allocation33_spill] sm:$0xff] }
 0x1fd   :  { %2674 = vmatprep.subr.bf16.mxu1 %v2673_v35  ;;  %v2677_v51 = vpack.c.bf16 %v4559_v31, %v4557_v6 }
 0x1fe   :  { %v2497_v12 = vpack.c.bf16 %v4571_v33, %v4570_v38  ;;  %v2685_v50 = vpack.c.bf16 %v4575_v22, %v4573_v15  ;;  %v2499_v11 = vpack.c.bf16 %v4577_v63, %v4576_v28  ;;  %v2689_v52 = vpack.c.bf16 %v4581_v58, %v4579_v60 }
 0x1ff   :  { %2488 = vmatpush1.bf16.msra.mxu0 %v2487_v0 }
 0x200   :  { %2676 = vmatpush3.bf16.msra.mxu1 %v2673_v35  ;;  %2490 = vmatprep.subr.bf16.mxu0 %v2489_v43 }
 0x201   :  { %2678 = vmatprep.subr.bf16.mxu1 %v2677_v51 }
 0x203   :  { %2492 = vmatpush1.bf16.msra.mxu0 %v2491_v18 }
 0x204   :  { %2680 = vmatpush3.bf16.msra.mxu1 %v2677_v51  ;;  %2494 = vmatprep.subr.bf16.mxu0 %v2493_v1 }
 0x205   :  { %2682 = vmatprep.subr.bf16.mxu1 %v2681_v61 }
 0x207   :  { %2496 = vmatpush1.bf16.msra.mxu0 %v2495_v55 }
 0x208   :  { %2684 = vmatpush3.bf16.msra.mxu1 %v2681_v61  ;;  %2498 = vmatprep.subr.bf16.mxu0 %v2497_v12 }
 0x209   :  { %2686 = vmatprep.subr.bf16.mxu1 %v2685_v50 }
 0x20b   :  { %2500 = vmatpush1.bf16.msra.mxu0 %v2499_v11 }
 0x20c   :  { %2688 = vmatpush3.bf16.msra.mxu1 %v2685_v50  ;;  %2502 = vmatprep.subr.bf16.mxu0 %v4492_v25  ;;  %v4584_v25 = vld [vmem:[#allocation37_spill] sm:$0xff] }
 0x20d   :  { %2690 = vmatprep.subr.bf16.mxu1 %v2689_v52 }
 0x20e   :  { %1038 = vmatmul.mubr.f32.vlgmr.msra.gmra.mrb[0].mxu0 %v3800_v3 }
 0x20f   :  { %2504 = vmatpush1.bf16.msra.mxu0 %v4494_v62  ;;  %1043 = vmatprep.mubr.f32.mxu0 %v4456_v56  ;;  %v4585_v62 = vld [vmem:[#allocation38_spill] sm:$0xff] }
 0x210   :  { %2692 = vmatpush3.bf16.msra.mxu1 %v2689_v52  ;;  %2506 = vmatprep.subr.bf16.mxu0 %v4495_v57  ;;  %v4586_v57 = vld [vmem:[#allocation39_spill] sm:$0xff] }
 0x211   :  { %2694 = vmatprep.subr.bf16.mxu1 %v4496_v2 }
 0x212   :  { %1045 = vmatmul.mubr.f32.gmra.mrb[2].mxu0 %v3809_v23 }
 0x213   :  { %2298 = vmatmul.mubr.f32.vlgmr.msra.gmra.mrb[0].mxu1 %v3809_v23  ;;  %2508 = vmatpush1.bf16.msra.mxu0 %v4497_v41  ;;  %v4588_v41 = vld [vmem:[#allocation43_spill] sm:$0xff] }
 0x214   :  { %2300 = vmatprep.mubr.f32.mxu1 %v3811_v48  ;;  %2696 = vmatpush3.bf16.msra.mxu1 %v4496_v2  ;;  %v4587_v2 = vld [vmem:[#allocation42_spill] sm:$0xff] }
 0x215   :  { %1050 = vmatprep.mubr.f32.mxu0 %v4456_v56  ;;  %2510 = vmatprep.subr.bf16.mxu0 %v4498_v40  ;;  %v4589_v40 = vld [vmem:[#allocation44_spill] sm:$0xff] }
 0x216   :  { %1052 = vmatmul.mubr.f32.gmra.mrb[4].mxu0 %v3811_v48  ;;  %2698 = vmatprep.subr.bf16.mxu1 %v4499_v14 }
 0x217   :  { %2301 = vmatmul.mubr.f32.gmra.mrb[2].mxu1 %v3824_v10  ;;  %2512 = vmatpush1.bf16.msra.mxu0 %v4500_v5  ;;  %v4591_v5 = vld [vmem:[#allocation47_spill] sm:$0xff] }
 0x218   :  { %2700 = vmatpush3.bf16.msra.mxu1 %v4499_v14  ;;  %2335 = vmatprep.mubr.f32.mxu1 %v3800_v3  ;;  %v4590_v14 = vld [vmem:[#allocation45_spill] sm:$0xff] }
 0x219   :  { %1057 = vmatprep.mubr.f32.mxu0 %v4456_v56  ;;  %2514 = vmatprep.subr.bf16.mxu0 %v4501_v9 }
 0x21a   :  { %1059 = vmatmul.mubr.f32.gmra.mrb[6].mxu0 %v3824_v10  ;;  %2702 = vmatprep.subr.bf16.mxu1 %v4502_v27 }
 0x21b   :  { %2516 = vmatpush1.bf16.msra.mxu0 %v4503_v21  ;;  %1161 = vmatprep.mubr.f32.mxu0 %v4456_v56 }
 0x21c   :  { %2704 = vmatpush3.bf16.msra.mxu1 %v4502_v27  ;;  %2518 = vmatprep.subr.bf16.mxu0 %v4504_v59 }
 0x21d   :  { %2706 = vmatprep.subr.bf16.mxu1 %v4582_v19 }
 0x21f   :  { %2520 = vmatpush1.bf16.msra.mxu0 %v4583_v26 }
 0x220   :  { %2708 = vmatpush3.bf16.msra.mxu1 %v4582_v19  ;;  %2522 = vmatprep.subr.bf16.mxu0 %v4584_v25 }
 0x221   :  { %2710 = vmatprep.subr.bf16.mxu1 %v4585_v62 }
 0x223   :  { %2524 = vmatpush1.bf16.msra.mxu0 %v4586_v57 }
 0x224   :  { %2712 = vmatpush3.bf16.msra.mxu1 %v4585_v62  ;;  %2526 = vmatprep.subr.bf16.mxu0 %v4587_v2 }
 0x225   :  { %2714 = vmatprep.subr.bf16.mxu1 %v4588_v41 }
 0x227   :  { %2528 = vmatpush1.bf16.msra.mxu0 %v4589_v40 }
 0x228   :  { %2716 = vmatpush3.bf16.msra.mxu1 %v4588_v41  ;;  %2530 = vmatprep.subr.bf16.mxu0 %v4590_v14 }
 0x229   :  { %2718 = vmatprep.subr.bf16.mxu1 %v4516_v46 }
 0x22b   :  { %2532 = vmatpush1.bf16.msra.mxu0 %v4591_v5 }
 0x22c   :  { %2720 = vmatpush3.bf16.msra.mxu1 %v4516_v46 }
 0x22d   :  { %2722 = vmatprep.subr.bf16.mxu1 %v4522_v16 }
 0x22e   :  { %1163 = vmatmul.mubr.f32.vlgmr.msra.gmra.mrb[0].mxu0 %v3800_v3 }
 0x22f   :  { %1168 = vmatprep.mubr.f32.mxu0 %v4456_v56 }
 0x230   :  { %2724 = vmatpush3.bf16.msra.mxu1 %v4522_v16 }
 0x232   :  { %1170 = vmatmul.mubr.f32.gmra.mrb[2].mxu0 %v3809_v23 }
 0x233   :  { %2336 = vmatmul.mubr.f32.vlgmr.msra.gmra.mrb[0].mxu1 %v3809_v23  ;;  %1175 = vmatprep.mubr.f32.mxu0 %v4456_v56 }
 0x234   :  { %2338 = vmatprep.mubr.f32.mxu1 %v3811_v48 }
 0x236   :  { %1177 = vmatmul.mubr.f32.gmra.mrb[4].mxu0 %v3811_v48 }
 0x237   :  { %2339 = vmatmul.mubr.f32.gmra.mrb[2].mxu1 %v3824_v10  ;;  %1182 = vmatprep.mubr.f32.mxu0 %v4456_v56 }
 0x23a   :  { %1184 = vmatmul.mubr.f32.gmra.mrb[6].mxu0 %v3824_v10 }
 0x301   :  { %v1164_v3 = vpop.f32.mrb[0].mxu0 }
 0x302   :  { %1960 = vst [vmem:[#allocation10] sm:$0xff] %v1164_v3  ;;  %v1166_v9 = vpop.f32.mrb[1].mxu0 }
 0x303   :  { %1961 = vst [vmem:[#allocation10 + $0x8] sm:$0xff] %v1166_v9 }
 0x305   :  { %v1171_v27 = vpop.f32.mrb[2].mxu0 }
 0x306   :  { %1963 = vst [vmem:[#allocation10 + $0x18] sm:$0xff] %v1171_v27  ;;  %v2337_v21 = vpop.f32.mrb[0].mxu1  ;;  %v1173_v23 = vpop.f32.mrb[3].mxu0 }
 0x307   :  { %1965 = vst [vmem:[#allocation10 + $0x28] sm:$0xff] %v2337_v21  ;;  %1964 = vst [vmem:[#allocation10 + $0x20] sm:$0xff] %v1173_v23  ;;  %v1938_v59 = vpop.f32.mrb[1].mxu1 }
 0x308   :  { %1962 = vst [vmem:[#allocation10 + $0x10] sm:$0xff] %v1938_v59 }
 0x309   :  { %v1178_v46 = vpop.f32.mrb[4].mxu0 }
 0x30a   :  { %1966 = vst [vmem:[#allocation10 + $0x30] sm:$0xff] %v1178_v46  ;;  %v2340_v48 = vpop.f32.mrb[2].mxu1  ;;  %v1180_v16 = vpop.f32.mrb[5].mxu0 }
 0x30b   :  { %1971 = vst [vmem:[#allocation10 + $0x58] sm:$0xff] %v2340_v48  ;;  %1967 = vst [vmem:[#allocation10 + $0x38] sm:$0xff] %v1180_v16  ;;  %v1950_v10 = vpop.f32.mrb[3].mxu1 }
 0x30c   :  { %1968 = vst [vmem:[#allocation10 + $0x40] sm:$0xff] %v1950_v10 }
 0x30d   :  { %v1185_v56 = vpop.f32.mrb[6].mxu0 }
 0x30e   :  { %1969 = vst [vmem:[#allocation10 + $0x48] sm:$0xff] %v1185_v56  ;;  %v1187_v37 = vpop.f32.mrb[7].mxu0 }
 0x30f   :  { %1970 = vst [vmem:[#allocation10 + $0x50] sm:$0xff] %v1187_v37 }
 0x310   :  { %2902 = shalt.err (!%p2899_p8)
}
 0x311   :  { %s2903_s17 = scalar_lea.hbm %s4177_s4, 1536 }
 0x312   :  { %p2904_p9 = scmp.ne.s32.totalorder %s4177_s4, %s2903_s17  ;;  %p2907_p10 = scmp.lt.u32.totalorder %s2903_s17, %s4177_s4 }
 0x314   :  { %p2909_p11 = pnand %p2907_p10, %p2904_p9 }
 0x316   :  { %2912 = shalt.err (!%p2909_p11)
}
 0x317   :  { %1983 = dma.vmem_to_hbm [thread:$0]  %s1978_s13, 1536, %s4177_s4, [#allocation4], %s2927_s2, %s2927_s2, %s2928_s11  }
 0x318   :  { %2919 = dma.done.wait [#allocation4], 1536  }
 0x319   :  { %2920 = vsyncadd [#allocation4], 4294965760 }
 0x31a   :  { %1987 = vsyncpa [#allocation3], 1 }
 0x31b   :  { %1988 = vsyncpa [#allocation6], 1 }
 0x31c   :  { %1989 = vsyncpa [#allocation9], 1 }
 0x31d   :  { %1990 = vsyncpa [#allocation4], 1 }

</bundles_post_ra>
